<compile_context>
chip_gen: v5e
topology: v5e:2x2
jax: 0.10.0
libtpu: 0.0.40
codegen_flags: <defaults>
</compile_context>

<pallas_src>
import functools

import jax
import jax.numpy as jnp
from jax import lax
from jax.experimental import pallas as pl
from jax.experimental.pallas import tpu as pltpu


def _avg_lgn_loss_kernel(seed_ref, idx_ref, tab_ref, loss_ref, sq_ref,
                         *, hist_k: int, drop: float, valid_rows: int):
    """One batch tile per grid step; the batch lives in the lane dimension.

    seed_ref: [1]              SMEM scalar-prefetch PRNG seed
    idx_ref : [K+2, TB] int32  columns = examples; rows 0..K-1 = history items,
                               row K = positive item, row K+1 = negative item
    tab_ref : [D, E]           transposed entity-embedding table (VMEM resident)
    loss_ref: [1, TB]          softplus(neg - pos) for this tile (lane dense)
    sq_ref  : [1, 1]           this tile's sum-of-squares contribution to reg
    """
    tile_b = idx_ref.shape[1]
    d, e = tab_ref.shape
    step = pl.program_id(0)

    tab_t = tab_ref[...].astype(jnp.float32)                        # [D, E]
    ent = lax.broadcasted_iota(jnp.int32, (e, tile_b), 0)           # [E, TB]

    def one_hot_t(row):                                             # [1,TB] -> [E,TB]
        return (ent == row).astype(jnp.float32)

    # ---- gathers as one-hot matmuls on the MXU ------------------------------
    # embedding_bag(mean): counts of each entity over the K history slots.
    w = one_hot_t(idx_ref[0:1, :])
    for j in range(1, hist_k):
        w = w + one_hot_t(idx_ref[j:j + 1, :])
    users_t = jnp.dot(tab_t, w, preferred_element_type=jnp.float32,
                      precision=lax.Precision.HIGHEST) * (1.0 / hist_k)
    pos_t = jnp.dot(tab_t, one_hot_t(idx_ref[hist_k:hist_k + 1, :]),
                    preferred_element_type=jnp.float32,
                    precision=lax.Precision.HIGHEST)                # [D, TB]
    neg_t = jnp.dot(tab_t, one_hot_t(idx_ref[hist_k + 1:hist_k + 2, :]),
                    preferred_element_type=jnp.float32,
                    precision=lax.Precision.HIGHEST)                # [D, TB]

    # ---- zero out padded examples (lanes beyond the true batch) -------------
    col = lax.broadcasted_iota(jnp.int32, (1, tile_b), 1) + step * tile_b
    valid = (col < valid_rows).astype(jnp.float32)                  # [1, TB]
    users_t = users_t * valid
    pos_t = pos_t * valid
    neg_t = neg_t * valid

    # ---- dropout: inverted scaling, per-tile seed, single bits draw ---------
    if drop > 0.0:
        pltpu.prng_seed(seed_ref[0] + step)
        bits = pltpu.bitcast(pltpu.prng_random_bits((3 * d, tile_b)), jnp.uint32)
        # uniform in [0, 1) from the top mantissa bits
        u = pltpu.bitcast((bits >> 9) | jnp.uint32(0x3F800000), jnp.float32) - 1.0
        scale = 1.0 / (1.0 - drop)

        def _drop(x, lo):
            return jnp.where(u[lo:lo + d, :] >= drop, x * scale, 0.0)

        users_t = _drop(users_t, 0)
        pos_t = _drop(pos_t, d)
        neg_t = _drop(neg_t, 2 * d)

    # ---- regularizer partial sum (post-dropout, matching the reference) -----
    sq_ref[...] = jnp.sum(users_t * users_t + pos_t * pos_t + neg_t * neg_t,
                          keepdims=True)                            # (1, 1)

    # ---- BPR-style pairwise term, lane-dense store ---------------------------
    pos_s = jnp.sum(users_t * pos_t, axis=0, keepdims=True)         # [1, TB]
    neg_s = jnp.sum(users_t * neg_t, axis=0, keepdims=True)         # [1, TB]
    # softplus(x) = log(1 + exp(x)), numerically stable via logaddexp
    loss_ref[...] = jnp.logaddexp(0.0, neg_s - pos_s).astype(loss_ref.dtype)


def avg_lgn_rec_loss(entity_embedding, hists, pos_items, neg_items,
                     *, drop: float, decay: float, seed: int = 0,
                     tile_b: int = 128):
    """Wrapper: index packing/transpose glue + batch-tiled Pallas kernel."""
    assert tile_b % 128 == 0, "tile_b must be a multiple of 128 (lane dim)"
    batch, hist_k = hists.shape
    num_ent, dim = entity_embedding.shape

    num_tiles = -(-batch // tile_b)
    batch_pad = num_tiles * tile_b

    # Glue: pack [hist | pos | neg] indices, pad the batch, transpose so the
    # batch sits in the lane dimension inside the kernel.  The entity table is
    # transposed once ([D, E]) so all in-kernel matmuls produce [D, tile_b].
    idx = jnp.concatenate(
        [hists.astype(jnp.int32),
         pos_items.astype(jnp.int32)[:, None],
         neg_items.astype(jnp.int32)[:, None]], axis=1)             # [B, K+2]
    if batch_pad != batch:
        idx = jnp.pad(idx, ((0, batch_pad - batch), (0, 0)))
    idx_t = idx.T                                                   # [K+2, Bp]
    tab_t = entity_embedding.T                                      # [D, E]  (bf16 tables also fine)

    seed_arr = jnp.asarray([seed], dtype=jnp.int32)

    kernel = functools.partial(_avg_lgn_loss_kernel, hist_k=hist_k,
                               drop=float(drop), valid_rows=batch)

    cost = pl.CostEstimate(
        flops=int(2 * batch_pad * num_ent * dim * 3
                  + batch_pad * num_ent * (hist_k + 2)),
        transcendentals=int(2 * batch_pad),
        bytes_accessed=int(num_ent * dim * entity_embedding.dtype.itemsize
                           + batch_pad * (hist_k + 2) * 4
                           + batch_pad * 4 + num_tiles * 4))

    loss_parts, sq_parts = pl.pallas_call(
        kernel,
        out_shape=(
            jax.ShapeDtypeStruct((num_tiles, 1, tile_b), jnp.float32),
            jax.ShapeDtypeStruct((num_tiles, 1, 1), jnp.float32),
        ),
        grid_spec=pltpu.PrefetchScalarGridSpec(
            num_scalar_prefetch=1,
            grid=(num_tiles,),
            in_specs=[
                # per-tile index columns (double-buffered by the pipeline)
                pl.BlockSpec((hist_k + 2, tile_b), lambda i, seed: (0, i)),
                # whole transposed table, constant block index -> fetched once
                pl.BlockSpec((dim, num_ent), lambda i, seed: (0, 0)),
            ],
            out_specs=[
                pl.BlockSpec((None, 1, tile_b), lambda i, seed: (i, 0, 0)),
                pl.BlockSpec((None, 1, 1), lambda i, seed: (i, 0, 0)),
            ],
        ),
        compiler_params=pltpu.CompilerParams(
            dimension_semantics=("parallel",),
            vmem_limit_bytes=32 * 1024 * 1024),
        cost_estimate=cost,
    )(seed_arr, idx_t, tab_t)

    # Whole-batch regularizer: finish the tiny cross-tile reduction here and
    # divide by the GLOBAL batch size (matches the reference exactly).
    reg_loss = jnp.sum(sq_parts) / batch / 2.0
    loss = loss_parts.reshape(-1)[:batch] + reg_loss * decay
    return loss                                                     # [B]


def _reference_loss(entity_embedding, hists, pos_items, neg_items,
                    *, drop: float, decay: float):
    """Pure-jnp reference (drop must be 0.0 for a deterministic comparison)."""
    assert drop == 0.0
    users = entity_embedding[hists].mean(axis=1)
    pos = entity_embedding[pos_items]
    neg = entity_embedding[neg_items]
    batch = pos_items.shape[0]
    reg = (jnp.sum(users ** 2) + jnp.sum(pos ** 2) + jnp.sum(neg ** 2)) / batch / 2.0
    pos_s = jnp.sum(users * pos, axis=-1)
    neg_s = jnp.sum(users * neg, axis=-1)
    return jnp.logaddexp(0.0, neg_s - pos_s) + reg * decay


if __name__ == "__main__":
    # Small, deterministic problem consistent with the module's config:
    #   num_entities=64, dim=32, k=8 history items per user.
    # batch=200 is deliberately NOT a multiple of the 128-row tile so the
    # padding / masking path of the gridded kernel is exercised.
    key = jax.random.PRNGKey(0)
    k_emb, k_hist, k_pos, k_neg = jax.random.split(key, 4)

    num_entities = 64
    dim = 32
    hist_k = 8
    batch = 200
    drop = 0.0          # F.dropout is identity at p=0; PRNG path exists for p>0
    decay = 1e-4

    # Deterministic "parameters": the compute_graph() output entity table.
    entity_embedding = 0.1 * jax.random.normal(
        k_emb, (num_entities, dim), dtype=jnp.float32)

    hists = jax.random.randint(k_hist, (batch, hist_k), 0, num_entities,
                               dtype=jnp.int32)
    pos_items = jax.random.randint(k_pos, (batch,), 0, num_entities,
                                   dtype=jnp.int32)
    neg_items = jax.random.randint(k_neg, (batch,), 0, num_entities,
                                   dtype=jnp.int32)

    loss = avg_lgn_rec_loss(entity_embedding, hists, pos_items, neg_items,
                            drop=drop, decay=decay, seed=0, tile_b=128)
    loss = jax.block_until_ready(loss)

    ref = _reference_loss(entity_embedding, hists, pos_items, neg_items,
                          drop=drop, decay=decay)
    assert loss.shape == (batch,)
    assert jnp.allclose(loss, ref, atol=1e-5, rtol=1e-5), (loss, ref)

    print("KERNEL_OK")
</pallas_src>

<mosaic_0001>
module attributes {stable_mosaic.version = 11 : i64} {
  func.func @_avg_lgn_loss_kernel(%arg0: i32, %arg1: memref<1xi32, #tpu.memory_space<smem>>, %arg2: memref<10x128xi32, #tpu.memory_space<vmem>>, %arg3: memref<32x64xf32, #tpu.memory_space<vmem>>, %arg4: memref<1x1x128xf32, #tpu.memory_space<vmem>>, %arg5: memref<1x1x1xf32, #tpu.memory_space<vmem>>) attributes {dimension_semantics = [#tpu.dimension_semantics<parallel>], iteration_bounds = array<i64: 2>, scalar_prefetch = 1 : i64, scratch_operands = 0 : i64, tpu.core_type = #tpu.core_type<tc>, window_params = [{transform_indices = @transform_0, window_bounds = array<i64: 10, 128>}, {pipeline_mode = #tpu.pipeline_mode<synchronous>, transform_indices = @transform_1, window_bounds = array<i64: 32, 64>}, {transform_indices = @transform_2, window_bounds = array<i64: 1, 1, 128>}, {transform_indices = @transform_3, window_bounds = array<i64: 1, 1, 1>}]} {
    %c0 = arith.constant 0 : index
    %c0_0 = arith.constant 0 : index
    %0 = vector.load %arg3[%c0, %c0_0] : memref<32x64xf32, #tpu.memory_space<vmem>>, vector<32x64xf32>
    %1 = tpu.iota {dimensions = array<i32: 0>} : vector<64x128xi32>
    %c0_1 = arith.constant 0 : index
    %c0_2 = arith.constant 0 : index
    %2 = vector.load %arg2[%c0_1, %c0_2] : memref<10x128xi32, #tpu.memory_space<vmem>>, vector<1x128xi32>
    %3 = vector.broadcast %2 : vector<1x128xi32> to vector<64x128xi32>
    %4 = arith.cmpi eq, %1, %3 : vector<64x128xi32>
    %5 = arith.extui %4 : vector<64x128xi1> to vector<64x128xi32>
    %6 = arith.sitofp %5 : vector<64x128xi32> to vector<64x128xf32>
    %c1 = arith.constant 1 : index
    %c0_3 = arith.constant 0 : index
    %7 = vector.load %arg2[%c1, %c0_3] : memref<10x128xi32, #tpu.memory_space<vmem>>, vector<1x128xi32>
    %8 = vector.broadcast %7 : vector<1x128xi32> to vector<64x128xi32>
    %9 = arith.cmpi eq, %1, %8 : vector<64x128xi32>
    %10 = arith.extui %9 : vector<64x128xi1> to vector<64x128xi32>
    %11 = arith.sitofp %10 : vector<64x128xi32> to vector<64x128xf32>
    %12 = arith.addf %6, %11 : vector<64x128xf32>
    %c2 = arith.constant 2 : index
    %c0_4 = arith.constant 0 : index
    %13 = vector.load %arg2[%c2, %c0_4] : memref<10x128xi32, #tpu.memory_space<vmem>>, vector<1x128xi32>
    %14 = vector.broadcast %13 : vector<1x128xi32> to vector<64x128xi32>
    %15 = arith.cmpi eq, %1, %14 : vector<64x128xi32>
    %16 = arith.extui %15 : vector<64x128xi1> to vector<64x128xi32>
    %17 = arith.sitofp %16 : vector<64x128xi32> to vector<64x128xf32>
    %18 = arith.addf %12, %17 : vector<64x128xf32>
    %c3 = arith.constant 3 : index
    %c0_5 = arith.constant 0 : index
    %19 = vector.load %arg2[%c3, %c0_5] : memref<10x128xi32, #tpu.memory_space<vmem>>, vector<1x128xi32>
    %20 = vector.broadcast %19 : vector<1x128xi32> to vector<64x128xi32>
    %21 = arith.cmpi eq, %1, %20 : vector<64x128xi32>
    %22 = arith.extui %21 : vector<64x128xi1> to vector<64x128xi32>
    %23 = arith.sitofp %22 : vector<64x128xi32> to vector<64x128xf32>
    %24 = arith.addf %18, %23 : vector<64x128xf32>
    %c4 = arith.constant 4 : index
    %c0_6 = arith.constant 0 : index
    %25 = vector.load %arg2[%c4, %c0_6] : memref<10x128xi32, #tpu.memory_space<vmem>>, vector<1x128xi32>
    %26 = vector.broadcast %25 : vector<1x128xi32> to vector<64x128xi32>
    %27 = arith.cmpi eq, %1, %26 : vector<64x128xi32>
    %28 = arith.extui %27 : vector<64x128xi1> to vector<64x128xi32>
    %29 = arith.sitofp %28 : vector<64x128xi32> to vector<64x128xf32>
    %30 = arith.addf %24, %29 : vector<64x128xf32>
    %c5 = arith.constant 5 : index
    %c0_7 = arith.constant 0 : index
    %31 = vector.load %arg2[%c5, %c0_7] : memref<10x128xi32, #tpu.memory_space<vmem>>, vector<1x128xi32>
    %32 = vector.broadcast %31 : vector<1x128xi32> to vector<64x128xi32>
    %33 = arith.cmpi eq, %1, %32 : vector<64x128xi32>
    %34 = arith.extui %33 : vector<64x128xi1> to vector<64x128xi32>
    %35 = arith.sitofp %34 : vector<64x128xi32> to vector<64x128xf32>
    %36 = arith.addf %30, %35 : vector<64x128xf32>
    %c6 = arith.constant 6 : index
    %c0_8 = arith.constant 0 : index
    %37 = vector.load %arg2[%c6, %c0_8] : memref<10x128xi32, #tpu.memory_space<vmem>>, vector<1x128xi32>
    %38 = vector.broadcast %37 : vector<1x128xi32> to vector<64x128xi32>
    %39 = arith.cmpi eq, %1, %38 : vector<64x128xi32>
    %40 = arith.extui %39 : vector<64x128xi1> to vector<64x128xi32>
    %41 = arith.sitofp %40 : vector<64x128xi32> to vector<64x128xf32>
    %42 = arith.addf %36, %41 : vector<64x128xf32>
    %c7 = arith.constant 7 : index
    %c0_9 = arith.constant 0 : index
    %43 = vector.load %arg2[%c7, %c0_9] : memref<10x128xi32, #tpu.memory_space<vmem>>, vector<1x128xi32>
    %44 = vector.broadcast %43 : vector<1x128xi32> to vector<64x128xi32>
    %45 = arith.cmpi eq, %1, %44 : vector<64x128xi32>
    %46 = arith.extui %45 : vector<64x128xi1> to vector<64x128xi32>
    %47 = arith.sitofp %46 : vector<64x128xi32> to vector<64x128xf32>
    %48 = arith.addf %42, %47 : vector<64x128xf32>
    %cst = arith.constant dense<0.000000e+00> : vector<32x128xf32>
    %49 = tpu.matmul %0, %48, %cst {dimension_numbers = #tpu.dot_dimension_numbers<[1], [0], [0], [1], [0, 0, 1, 1], [], []>, precision = #tpu.contract_precision<fp32>} : vector<32x64xf32>, vector<64x128xf32>, vector<32x128xf32> -> vector<32x128xf32>
    %cst_10 = arith.constant 1.250000e-01 : f32
    %50 = vector.broadcast %cst_10 : f32 to vector<32x128xf32>
    %51 = arith.mulf %49, %50 : vector<32x128xf32>
    %c8 = arith.constant 8 : index
    %c0_11 = arith.constant 0 : index
    %52 = vector.load %arg2[%c8, %c0_11] : memref<10x128xi32, #tpu.memory_space<vmem>>, vector<1x128xi32>
    %53 = vector.broadcast %52 : vector<1x128xi32> to vector<64x128xi32>
    %54 = arith.cmpi eq, %1, %53 : vector<64x128xi32>
    %55 = arith.extui %54 : vector<64x128xi1> to vector<64x128xi32>
    %56 = arith.sitofp %55 : vector<64x128xi32> to vector<64x128xf32>
    %cst_12 = arith.constant dense<0.000000e+00> : vector<32x128xf32>
    %57 = tpu.matmul %0, %56, %cst_12 {dimension_numbers = #tpu.dot_dimension_numbers<[1], [0], [0], [1], [0, 0, 1, 1], [], []>, precision = #tpu.contract_precision<fp32>} : vector<32x64xf32>, vector<64x128xf32>, vector<32x128xf32> -> vector<32x128xf32>
    %c9 = arith.constant 9 : index
    %c0_13 = arith.constant 0 : index
    %58 = vector.load %arg2[%c9, %c0_13] : memref<10x128xi32, #tpu.memory_space<vmem>>, vector<1x128xi32>
    %59 = vector.broadcast %58 : vector<1x128xi32> to vector<64x128xi32>
    %60 = arith.cmpi eq, %1, %59 : vector<64x128xi32>
    %61 = arith.extui %60 : vector<64x128xi1> to vector<64x128xi32>
    %62 = arith.sitofp %61 : vector<64x128xi32> to vector<64x128xf32>
    %cst_14 = arith.constant dense<0.000000e+00> : vector<32x128xf32>
    %63 = tpu.matmul %0, %62, %cst_14 {dimension_numbers = #tpu.dot_dimension_numbers<[1], [0], [0], [1], [0, 0, 1, 1], [], []>, precision = #tpu.contract_precision<fp32>} : vector<32x64xf32>, vector<64x128xf32>, vector<32x128xf32> -> vector<32x128xf32>
    %64 = tpu.iota {dimensions = array<i32: 1>} : vector<1x128xi32>
    %c128_i32 = arith.constant 128 : i32
    %65 = arith.muli %arg0, %c128_i32 : i32
    %66 = vector.broadcast %65 : i32 to vector<1x128xi32>
    %67 = arith.addi %64, %66 : vector<1x128xi32>
    %c200_i32 = arith.constant 200 : i32
    %68 = vector.broadcast %c200_i32 : i32 to vector<1x128xi32>
    %69 = arith.cmpi slt, %67, %68 : vector<1x128xi32>
    %70 = arith.extui %69 : vector<1x128xi1> to vector<1x128xi32>
    %71 = arith.sitofp %70 : vector<1x128xi32> to vector<1x128xf32>
    %72 = vector.broadcast %71 : vector<1x128xf32> to vector<32x128xf32>
    %73 = arith.mulf %51, %72 : vector<32x128xf32>
    %74 = vector.broadcast %71 : vector<1x128xf32> to vector<32x128xf32>
    %75 = arith.mulf %57, %74 : vector<32x128xf32>
    %76 = vector.broadcast %71 : vector<1x128xf32> to vector<32x128xf32>
    %77 = arith.mulf %63, %76 : vector<32x128xf32>
    %78 = arith.mulf %73, %73 : vector<32x128xf32>
    %79 = arith.mulf %75, %75 : vector<32x128xf32>
    %80 = arith.addf %78, %79 : vector<32x128xf32>
    %81 = arith.mulf %77, %77 : vector<32x128xf32>
    %82 = arith.addf %80, %81 : vector<32x128xf32>
    %83 = vector.shape_cast %82 : vector<32x128xf32> to vector<1x32x128xf32>
    %cst_15 = arith.constant dense<0.000000e+00> : vector<1xf32>
    %84 = vector.multi_reduction <add>, %83, %cst_15 [1, 2] : vector<1x32x128xf32> to vector<1xf32>
    %85 = vector.shape_cast %84 : vector<1xf32> to vector<1x1x1xf32>
    %86 = vector.extract %85[0, 0, 0] : f32 from vector<1x1x1xf32>
    %87 = vector.broadcast %86 : f32 to vector<1x1xf32>
    %c0_16 = arith.constant 0 : index
    %c0_17 = arith.constant 0 : index
    %c0_18 = arith.constant 0 : index
    %88 = vector.load %arg5[%c0_16, %c0_17, %c0_18] : memref<1x1x1xf32, #tpu.memory_space<vmem>>, vector<1x1x1xf32>
    %89 = vector.shape_cast %88 : vector<1x1x1xf32> to vector<1x1xf32>
    %90 = vector.shape_cast %87 : vector<1x1xf32> to vector<1x1x1xf32>
    tpu.vector_store %arg5[%c0_16, %c0_17, %c0_18], %90 {strides = array<i32>} : memref<1x1x1xf32, #tpu.memory_space<vmem>>, vector<1x1x1xf32>,
    %91 = arith.mulf %73, %75 : vector<32x128xf32>
    %cst_19 = arith.constant dense<0.000000e+00> : vector<128xf32>
    %92 = vector.multi_reduction <add>, %91, %cst_19 [0] : vector<32x128xf32> to vector<128xf32>
    %93 = vector.shape_cast %92 : vector<128xf32> to vector<1x128xf32>
    %94 = arith.mulf %73, %77 : vector<32x128xf32>
    %cst_20 = arith.constant dense<0.000000e+00> : vector<128xf32>
    %95 = vector.multi_reduction <add>, %94, %cst_20 [0] : vector<32x128xf32> to vector<128xf32>
    %96 = vector.shape_cast %95 : vector<128xf32> to vector<1x128xf32>
    %97 = arith.subf %96, %93 : vector<1x128xf32>
    %cst_21 = arith.constant 0.000000e+00 : f32
    %98 = vector.broadcast %cst_21 : f32 to vector<1x128xf32>
    %99 = arith.maximumf %98, %97 : vector<1x128xf32>
    %100 = vector.broadcast %cst_21 : f32 to vector<1x128xf32>
    %101 = arith.subf %100, %97 : vector<1x128xf32>
    %102 = arith.cmpf one, %101, %101 : vector<1x128xf32>
    %103 = vector.broadcast %cst_21 : f32 to vector<1x128xf32>
    %104 = arith.addf %103, %97 : vector<1x128xf32>
    %105 = math.absf %101 : vector<1x128xf32>
    %cst_22 = arith.constant 0.000000e+00 : f32
    %106 = vector.broadcast %cst_22 : f32 to vector<1x128xf32>
    %107 = arith.subf %106, %105 : vector<1x128xf32>
    %108 = math.exp %107 : vector<1x128xf32>
    %109 = math.log1p %108 : vector<1x128xf32>
    %110 = arith.addf %99, %109 : vector<1x128xf32>
    %111 = arith.select %102, %104, %110 : vector<1x128xi1>, vector<1x128xf32>
    %c0_23 = arith.constant 0 : index
    %c0_24 = arith.constant 0 : index
    %c0_25 = arith.constant 0 : index
    %112 = vector.load %arg4[%c0_23, %c0_24, %c0_25] : memref<1x1x128xf32, #tpu.memory_space<vmem>>, vector<1x1x128xf32>
    %113 = vector.shape_cast %112 : vector<1x1x128xf32> to vector<1x128xf32>
    %114 = vector.shape_cast %111 : vector<1x128xf32> to vector<1x1x128xf32>
    tpu.vector_store %arg4[%c0_23, %c0_24, %c0_25], %114 {strides = array<i32>} : memref<1x1x128xf32, #tpu.memory_space<vmem>>, vector<1x1x128xf32>,
    return
  }
  func.func @transform_0(%arg0: i32, %arg1: memref<1xi32, #tpu.memory_space<smem>>) -> (i32, i32) {
    %c0_i32 = arith.constant 0 : i32
    %c0_i32_0 = arith.constant 0 : i32
    return %c0_i32, %arg0 : i32, i32
  }
  func.func @transform_1(%arg0: i32, %arg1: memref<1xi32, #tpu.memory_space<smem>>) -> (i32, i32) {
    %c0_i32 = arith.constant 0 : i32
    %c0_i32_0 = arith.constant 0 : i32
    %c0_i32_1 = arith.constant 0 : i32
    return %c0_i32, %c0_i32_0 : i32, i32
  }
  func.func @transform_2(%arg0: i32, %arg1: memref<1xi32, #tpu.memory_space<smem>>) -> (i32, i32, i32) {
    %c0_i32 = arith.constant 0 : i32
    %c0_i32_0 = arith.constant 0 : i32
    %c0_i32_1 = arith.constant 0 : i32
    return %arg0, %c0_i32, %c0_i32_0 : i32, i32, i32
  }
  func.func @transform_3(%arg0: i32, %arg1: memref<1xi32, #tpu.memory_space<smem>>) -> (i32, i32, i32) {
    %c0_i32 = arith.constant 0 : i32
    %c0_i32_0 = arith.constant 0 : i32
    %c0_i32_1 = arith.constant 0 : i32
    return %arg0, %c0_i32, %c0_i32_0 : i32, i32, i32
  }
}

</mosaic_0001>

<bundles_post_ra>
// kernel: tpu_custom_call.1
= control target key start
LH: loop header
LB: loop body
LE: loop exit
PB: predicated region body
PF: predicated region fallthrough
CT: control target
= control target key end

     0   :  { %11 = vsyncpa [#allocation5], 0  ;;  %s3313_s0 = inlined_call_operand.<no memory space> [shape: s32[1], index: 0, kind: input, shape index: {}]   ;;  %s3314_s1 = inlined_call_operand.hbm [shape: s32[10,256], index: 1, kind: input, shape index: {}]   ;;  %s3315_s2 = inlined_call_operand.hbm [shape: f32[32,64], index: 2, kind: input, shape index: {}]   ;;  %s3316_s3 = inlined_call_operand.hbm [shape: f32[2,1,128], index: 3, kind: output, shape index: {0}]   ;;  %s3317_s4 = inlined_call_operand.vmem [shape: f32[2,1,1], index: 4, kind: output, shape index: {1}]  }
   0x1   :  { %13 = vsyncpa [#allocation5 + $0x1], 0 }
   0x2   :  { %14 = vsyncpa [#allocation8], 0 }
   0x3   :  { %15 = vsyncpa [#allocation6], 0 }
   0x4   :  { %17 = vsyncpa [#allocation6 + $0x1], 0  ;;  %s2167_s15 = smov 0   ;;  %s2169_s0 = smov 0  }
   0x5   :  { %s2171_s16 = smov 0   ;;  %s2173_s17 = smov 0  }
   0x6 LB: > { %s2188_s18 = sadd.s32 4294967295, %s2134_s17   ;;  %s1769_s19 = sadd.s32 4294967294, %s2134_s17   ;;  %s2134_s17 = sphi %s2173_s17, %s3327_s17   ;;  %s2130_s16 = sphi %s2171_s16, %s3326_s16   ;;  %s2126_s0 = sphi %s2169_s0, %s3325_s0   ;;  %s2122_s15 = sphi %s2167_s15, %s3324_s15  }
   0x7   : > { %p43_p0 = scmp.ne.s32.totalorder %s2126_s0, %s2122_s15  ;;  %p44_p1 = scmp.eq.s32.totalorder %s2188_s18, 0 }
   0x8   : > { %p88_p2 = scmp.eq.s32.totalorder %s2188_s18, 1  ;;  %p94_p3 = scmp.eq.s32.totalorder %s1769_s19, 1 }
   0x9   : > { %p2197_p4 = por %p44_p1, %p43_p0  ;;  %p1770_p5 = scmp.ge.s32.totalorder %s2134_s17, 1 }
   0xa   : > { %p2202_p6 = por %p94_p3, %p43_p0  ;;  %p127_p7 = scmp.lt.s32.totalorder %s2134_s17, 3 }
   0xb   : > { %s138_s24 = sshll.u32 %s3315_s2, 4  ;;  %s2136_s26 = smov [#allocation7]   ;;  %s139_s24 = int_to_ptr.hbm [resolvable:$true] %s138_s24 }
   0xc   : > { %p2210_p8 = pnand %p1770_p5, %p127_p7  ;;  %s140_s27 = sshll.u32 %s2136_s26, 4  ;;  %s141_s27 = int_to_ptr.vmem [resolvable:$true] %s140_s27 }
   0xd   : > { %s2220_s28 = sadd.s32 1, %s2134_s17   ;;  %s2137_s29 = smov 128  }
   0xe   : > { %p1936_p9 = pneg %p2210_p8  ;;  %s2138_s30 = smov 8  }
   0xf   : > { %s27_s5 = ssub.s32 %s2134_s17, %s2220_s28  ;;  %s30_s6 = sadd.s32 1, %s2130_s16 }
  0x10   : > { %p1937_p10 = pnand %p1936_p9, %p44_p1  ;;  %p28_p12 = scmp.eq.s32.totalorder %s27_s5, 0 }
  0x11   : > { %p37_p13 = scmp.ne.s32.totalorder %s2130_s16, %s2126_s0  ;;  %p38_p0 = scmp.eq.s32.totalorder %s2134_s17, 0 }
  0x12   : > { %1939 = dma.hbm_to_vmem [thread:$0]  (!%p1937_p10), %s139_s24, 512, %s141_s27, [#allocation8], %s2137_s29, %s2137_s29, %s2138_s30  }
  0x13   : > { %p1949_p3 = scmp.lt.s32.totalorder %s2134_s17, 2  ;;  %p39_p5 = por %p38_p0, %p37_p13 }
  0x14   : > { %s2233_s7 = scalar_select %p28_p12, %s2130_s16, %s30_s6  }
  0x15   : > { %p2237_p7 = por %p88_p2, %p37_p13  ;;  %s154_s9 = sand.u32 1, %s2130_s16  }
  0x16   : > { %s1774_s10 = sshll.u32 %s2134_s17, 3  ;;  %s1773_s11 = sshll.u32 %s154_s9, 4 }
  0x17   : > { %s162_s14 = scalar_lea.hbm %s3314_s1, %s1774_s10  ;;  %s158_s22 = scalar_lea.vmem [#allocation4], %s1773_s11 }
  0x18   : > { %s163_s19 = sshll.u32 %s162_s14, 4  ;;  %s165_s23 = sshll.u32 %s158_s22, 4  ;;  %s164_s19 = int_to_ptr.hbm [resolvable:$true] %s163_s19  ;;  %s166_s23 = int_to_ptr.vmem [resolvable:$true] %s165_s23 }
  0x19   : > { %p2248_p9 = pnand %p1949_p3, %p39_p5  ;;  %s155_s26 = scalar_lea.sflag [#allocation5], %s154_s9 }
  0x1a   : > { %s2034_s27 = sshra.s32 %s164_s19, 4  ;;  %s2041_s11 = scalar_lea.hbm %s3314_s1, 32  ;;  %s2035_s27 = int_to_ptr.hbm [resolvable:$true] %s2034_s27 }
  0x1b   : > { %s2036_s5 = scalar_lea.hbm %s2035_s27, 16  ;;  %p2038_p10 = pneg %p2248_p9 }
  0x1c   : > { %p2037_p2 = scmp.ne.s32.totalorder %s2035_s27, %s2036_s5  ;;  %p2042_p0 = scmp.lt.s32.totalorder %s2035_s27, %s3314_s1 }
  0x1d   : > { %p2043_p3 = scmp.lt.s32.totalorder %s2041_s11, %s2036_s5 }
  0x1e   : > { %p2039_p12 = pnand %p2038_p10, %p2037_p2 }
  0x1f   : > { %p2044_p5 = por %p2043_p3, %p2042_p0 }
  0x20   : > { %p2040_p13 = pneg %p2039_p12 }
  0x22   : > { %p2045_p11 = pnand %p2044_p5, %p2040_p13 }
  0x24   : > { %2048 = shalt.err (!%p2045_p11)
}
  0x25   : > { %s2139_s9 = smov 256   ;;  %177 = sbr.rel (%p2210_p8) target bundleno = 582 (0x246), region = 28 }
  0x26   : > { %1943 = dma.hbm_to_vmem [thread:$0]  (!%p2248_p9), %s164_s19, 256, %s166_s23, %s155_s26, %s2139_s9, %s2137_s29, %s2138_s30  }
  0x27   : > { %s2267_s14 = sand.u32 (!%p2210_p8), 1, %s2126_s0  }
  0x28   : > { %s1776_s22 = sshll.u32 (!%p2210_p8), %s2267_s14, 4  ;;  %s180_s27 = scalar_lea.sflag (!%p2210_p8), [#allocation5], %s2267_s14 }
  0x29   : > { %s2271_s5 = scalar_lea.vmem (!%p2210_p8), [#allocation4], %s1776_s22 }
  0x2a   : > { %2109 = dma.done.wait (%p2197_p4), %s180_s27, 256  }
  0x2b   : > { %2111 = vsyncadd (%p2197_p4), %s180_s27, 4294967040 }
  0x2c   : > { %2113 = dma.done.wait (%p44_p1), [#allocation8], 512  }
  0x2d   : > { %2115 = vsyncadd (%p44_p1), [#allocation8], 4294966784  ;;  %v221_v0 = vlaneseq  ;;  %v2306_v9 = vld [vmem:[%s2271_s5] ss:$0 sm:$0xff]  ;;  %v2309_v10 = vld [vmem:[%s2271_s5 + $0x1] ss:$0 sm:$0xff]  ;;  %s1667_s19 = scalar_lea.hbm %s3316_s3, %s2188_s18 }
  0x2e   : > { %v2312_v11 = vld [vmem:[%s2271_s5 + $0x2] ss:$0 sm:$0xff]  ;;  %v2317_v12 = vld [vmem:[%s2271_s5 + $0x3] ss:$0 sm:$0xff]  ;;  %v2140_v13 = vmov 0.0   ;;  %s1906_s20 = sshll.u32 %s2188_s18, 7 }
  0x2f   : > { %v2282_v1 = vshrl.u32 %v221_v0, 7  ;;  %v2329_v15 = vld [vmem:[%s2271_s5 + $0x4] ss:$0 sm:$0xff]  ;;  %v2337_v19 = vld [vmem:[%s2271_s5 + $0x5] ss:$0 sm:$0xff]  ;;  %s208_s25 = scalar_lea.vmem [#allocation9], %s2267_s14 }
  0x30   : > { %v2345_v22 = vld [vmem:[%s2271_s5 + $0x6] ss:$0 sm:$0xff]  ;;  %v2352_v25 = vld [vmem:[%s2271_s5 + $0x7] ss:$0 sm:$0xff]  ;;  %s1669_s23 = sshll.u32 %s208_s25, 4  ;;  %s1671_s24 = sshll.u32 %s1667_s19, 4  ;;  %s1670_s23 = int_to_ptr.vmem [resolvable:$true] %s1669_s23  ;;  %s1672_s24 = int_to_ptr.hbm [resolvable:$true] %s1671_s24 }
  0x31   : > { %v2285_v2 = vadd.s32 56, %v2282_v1  ;;  %v2288_v3 = vadd.s32 48, %v2282_v1  ;;  %v2291_v4 = vadd.s32 40, %v2282_v1  ;;  %v2294_v5 = vadd.s32 32, %v2282_v1  ;;  %s1656_s26 = scalar_lea.sflag [#allocation6], %s2267_s14  ;;  %s2078_s6 = sshra.s32 %s1672_s24, 4  ;;  %s2079_s6 = int_to_ptr.hbm [resolvable:$true] %s2078_s6 }
  0x32   : > { %v2297_v6 = vadd.s32 24, %v2282_v1  ;;  %v2300_v7 = vadd.s32 16, %v2282_v1  ;;  %v2303_v8 = vadd.s32 8, %v2282_v1  ;;  %s2080_s10 = scalar_lea.hbm %s2079_s6, 1  ;;  %s2084_s13 = scalar_lea.hbm %s3316_s3, 2 }
  0x33   : > { %vm239_vm0 = vcmp.eq.s32.totalorder %v2285_v2, %v2306_v9  ;;  %vm238_vm1 = vcmp.eq.s32.totalorder %v2288_v3, %v2306_v9  ;;  %vm237_vm2 = vcmp.eq.s32.totalorder %v2291_v4, %v2306_v9  ;;  %vm265_vm3 = vcmp.eq.s32.totalorder %v2285_v2, %v2309_v10  ;;  %p2081_p1 = scmp.ne.s32.totalorder %s2079_s6, %s2080_s10  ;;  %p2085_p11 = scmp.lt.s32.totalorder %s2079_s6, %s3316_s3 }
  0x34   : > { %v1785_v14 = vsel %vm239_vm0, 1.0, %v2140_v13  ;;  %vm299_vm4 = vcmp.eq.s32.totalorder %v2285_v2, %v2312_v11  ;;  %v1784_v16 = vsel %vm238_vm1, 1.0, %v2140_v13  ;;  %v1793_v17 = vsel %vm265_vm3, 1.0, %v2140_v13  ;;  %p2086_p9 = scmp.lt.s32.totalorder %s2084_s13, %s2080_s10 }
  0x35   : > { %v1801_v18 = vsel %vm299_vm4, 1.0, %v2140_v13  ;;  %vm333_vm5 = vcmp.eq.s32.totalorder %v2285_v2, %v2317_v12  ;;  %vm264_vm6 = vcmp.eq.s32.totalorder %v2288_v3, %v2309_v10  ;;  %v289_v20 = vadd.f32 %v1793_v17, %v1785_v14  ;;  %p2082_p4 = pnand %p2081_p1, %p2237_p7 }
  0x36   : > { %v1809_v21 = vsel %vm333_vm5, 1.0, %v2140_v13  ;;  %vm367_vm7 = vcmp.eq.s32.totalorder %v2285_v2, %v2329_v15  ;;  %v1792_v23 = vsel %vm264_vm6, 1.0, %v2140_v13  ;;  %vm401_vm8 = vcmp.eq.s32.totalorder %v2285_v2, %v2337_v19  ;;  %p2087_p2 = por %p2086_p9, %p2085_p11 }
  0x37   : > { %v1817_v24 = vsel %vm367_vm7, 1.0, %v2140_v13  ;;  %v288_v26 = vadd.f32 %v1792_v23, %v1784_v16  ;;  %vm298_vm9 = vcmp.eq.s32.totalorder %v2288_v3, %v2312_v11  ;;  %vm236_vm10 = vcmp.eq.s32.totalorder %v2294_v5, %v2306_v9  ;;  %p2083_p8 = pneg %p2082_p4 }
  0x38   : > { %v323_v27 = vadd.f32 %v1801_v18, %v289_v20  ;;  %v1825_v28 = vsel %vm401_vm8, 1.0, %v2140_v13  ;;  %vm435_vm11 = vcmp.eq.s32.totalorder %v2285_v2, %v2345_v22  ;;  %v1800_v29 = vsel %vm298_vm9, 1.0, %v2140_v13 }
  0x39   : > { %v1833_v30 = vsel %vm435_vm11, 1.0, %v2140_v13  ;;  %vm469_vm12 = vcmp.eq.s32.totalorder %v2285_v2, %v2352_v25  ;;  %v322_v31 = vadd.f32 %v1800_v29, %v288_v26  ;;  %vm332_vm13 = vcmp.eq.s32.totalorder %v2288_v3, %v2317_v12  ;;  %p2088_p10 = pnand %p2087_p2, %p2083_p8 }
  0x3a   : > { %v357_v32 = vadd.f32 %v1809_v21, %v323_v27  ;;  %v1841_v33 = vsel %vm469_vm12, 1.0, %v2140_v13  ;;  %v1808_v34 = vsel %vm332_vm13, 1.0, %v2140_v13  ;;  %vm366_vm14 = vcmp.eq.s32.totalorder %v2288_v3, %v2329_v15 }
  0x3b   : > { %v356_v35 = vadd.f32 %v1808_v34, %v322_v31  ;;  %v1816_v36 = vsel %vm366_vm14, 1.0, %v2140_v13  ;;  %vm400_vm15 = vcmp.eq.s32.totalorder %v2288_v3, %v2337_v19  ;;  %vm434_vm0 = vcmp.eq.s32.totalorder %v2288_v3, %v2345_v22 }
  0x3c   : > { %v391_v37 = vadd.f32 %v1817_v24, %v357_v32  ;;  %v1824_v38 = vsel %vm400_vm15, 1.0, %v2140_v13  ;;  %v1832_v39 = vsel %vm434_vm0, 1.0, %v2140_v13  ;;  %vm468_vm1 = vcmp.eq.s32.totalorder %v2288_v3, %v2352_v25 }
  0x3d   : > { %v390_v40 = vadd.f32 %v1816_v36, %v356_v35  ;;  %v1840_v41 = vsel %vm468_vm1, 1.0, %v2140_v13  ;;  %v1783_v42 = vsel %vm237_vm2, 1.0, %v2140_v13  ;;  %vm263_vm3 = vcmp.eq.s32.totalorder %v2291_v4, %v2309_v10 }
  0x3e   : > { %v425_v43 = vadd.f32 %v1825_v28, %v391_v37  ;;  %v1791_v44 = vsel %vm263_vm3, 1.0, %v2140_v13  ;;  %vm297_vm4 = vcmp.eq.s32.totalorder %v2291_v4, %v2312_v11  ;;  %vm331_vm5 = vcmp.eq.s32.totalorder %v2291_v4, %v2317_v12 }
  0x3f   : > { %v424_v45 = vadd.f32 %v1824_v38, %v390_v40  ;;  %v287_v46 = vadd.f32 %v1791_v44, %v1783_v42  ;;  %v1799_v47 = vsel %vm297_vm4, 1.0, %v2140_v13  ;;  %v1807_v48 = vsel %vm331_vm5, 1.0, %v2140_v13 }
  0x40   : > { %v459_v49 = vadd.f32 %v1833_v30, %v425_v43  ;;  %vm365_vm2 = vcmp.eq.s32.totalorder %v2291_v4, %v2329_v15  ;;  %vm399_vm6 = vcmp.eq.s32.totalorder %v2291_v4, %v2337_v19  ;;  %vm433_vm7 = vcmp.eq.s32.totalorder %v2291_v4, %v2345_v22 }
  0x41   : > { %v458_v50 = vadd.f32 %v1832_v39, %v424_v45  ;;  %v321_v51 = vadd.f32 %v1799_v47, %v287_v46  ;;  %v1815_v52 = vsel %vm365_vm2, 1.0, %v2140_v13  ;;  %v1823_v53 = vsel %vm399_vm6, 1.0, %v2140_v13 }
  0x42   : > { %v493_v54 = vadd.f32 %v1841_v33, %v459_v49  ;;  %v1831_v55 = vsel %vm433_vm7, 1.0, %v2140_v13  ;;  %vm467_vm8 = vcmp.eq.s32.totalorder %v2291_v4, %v2352_v25  ;;  %v1782_v56 = vsel %vm236_vm10, 1.0, %v2140_v13 }
  0x43   : > { %v2409_v57 = vadd.f32 %v1840_v41, %v458_v50  ;;  %v355_v58 = vadd.f32 %v1807_v48, %v321_v51  ;;  %v1839_v59 = vsel %vm467_vm8, 1.0, %v2140_v13  ;;  %vm262_vm9 = vcmp.eq.s32.totalorder %v2294_v5, %v2309_v10 }
  0x44   : > { %v2414_v60 = vand.u32 4294901760, %v493_v54  ;;  %v1790_v61 = vsel %vm262_vm9, 1.0, %v2140_v13  ;;  %vm296_vm11 = vcmp.eq.s32.totalorder %v2294_v5, %v2312_v11  ;;  %vm330_vm12 = vcmp.eq.s32.totalorder %v2294_v5, %v2317_v12 }
  0x45   : > { %v2422_v62 = vand.u32 4294901760, %v2409_v57  ;;  %v389_v63 = vadd.f32 %v1815_v52, %v355_v58  ;;  %v286_v14 = vadd.f32 %v1790_v61, %v1782_v56  ;;  %v1798_v16 = vsel %vm296_vm11, 1.0, %v2140_v13 }
  0x46   : > { %1910 = vmatpush.msra.mxu2 %v2414_v60  ;;  %v1806_v17 = vsel %vm330_vm12, 1.0, %v2140_v13  ;;  %vm364_vm10 = vcmp.eq.s32.totalorder %v2294_v5, %v2329_v15  ;;  %vm398_vm13 = vcmp.eq.s32.totalorder %v2294_v5, %v2337_v19  ;;  %vm432_vm14 = vcmp.eq.s32.totalorder %v2294_v5, %v2345_v22  ;;  %516 = vmatpush.msra.mxu0 %v2414_v60 }
  0x47   : > { %v423_v18 = vadd.f32 %v1823_v53, %v389_v63  ;;  %v320_v20 = vadd.f32 %v1798_v16, %v286_v14  ;;  %v1814_v21 = vsel %vm364_vm10, 1.0, %v2140_v13  ;;  %v1822_v23 = vsel %vm398_vm13, 1.0, %v2140_v13 }
  0x48   : > { %1911 = vmatpush.msra.mxu2 %v2422_v62  ;;  %v1830_v24 = vsel %vm432_vm14, 1.0, %v2140_v13  ;;  %vm466_vm15 = vcmp.eq.s32.totalorder %v2294_v5, %v2352_v25  ;;  %vm235_vm0 = vcmp.eq.s32.totalorder %v2297_v6, %v2306_v9  ;;  %vm261_vm1 = vcmp.eq.s32.totalorder %v2297_v6, %v2309_v10  ;;  %518 = vmatpush.msra.mxu0 %v2422_v62 }
  0x49   : > { %v457_v26 = vadd.f32 %v1831_v55, %v423_v18  ;;  %v354_v27 = vadd.f32 %v1806_v17, %v320_v20  ;;  %v1838_v28 = vsel %vm466_vm15, 1.0, %v2140_v13  ;;  %v1781_v29 = vsel %vm235_vm0, 1.0, %v2140_v13 }
  0x4a   : > { %v1789_v30 = vsel %vm261_vm1, 1.0, %v2140_v13  ;;  %vm295_vm3 = vcmp.eq.s32.totalorder %v2297_v6, %v2312_v11  ;;  %vm329_vm4 = vcmp.eq.s32.totalorder %v2297_v6, %v2317_v12  ;;  %vm363_vm5 = vcmp.eq.s32.totalorder %v2297_v6, %v2329_v15 }
  0x4b   : > { %v2454_v31 = vadd.f32 %v1839_v59, %v457_v26  ;;  %v388_v32 = vadd.f32 %v1814_v21, %v354_v27  ;;  %v285_v33 = vadd.f32 %v1789_v30, %v1781_v29  ;;  %v1797_v34 = vsel %vm295_vm3, 1.0, %v2140_v13 }
  0x4c   : > { %v1805_v35 = vsel %vm329_vm4, 1.0, %v2140_v13  ;;  %v1813_v36 = vsel %vm363_vm5, 1.0, %v2140_v13  ;;  %vm397_vm2 = vcmp.eq.s32.totalorder %v2297_v6, %v2337_v19  ;;  %vm431_vm6 = vcmp.eq.s32.totalorder %v2297_v6, %v2345_v22 }
  0x4d   : > { %v2464_v37 = vand.u32 4294901760, %v2454_v31  ;;  %v422_v38 = vadd.f32 %v1822_v23, %v388_v32  ;;  %v319_v39 = vadd.f32 %v1797_v34, %v285_v33  ;;  %v1821_v40 = vsel %vm397_vm2, 1.0, %v2140_v13 }
  0x4e   : > { %v1829_v41 = vsel %vm431_vm6, 1.0, %v2140_v13  ;;  %vm465_vm7 = vcmp.eq.s32.totalorder %v2297_v6, %v2352_v25  ;;  %v2471_v42 = vsub.f32 %v493_v54, %v2414_v60  ;;  %vm234_vm8 = vcmp.eq.s32.totalorder %v2300_v7, %v2306_v9 }
  0x4f   : > { %1912 = vmatpush.msra.mxu2 %v2464_v37  ;;  %v456_v43 = vadd.f32 %v1830_v24, %v422_v38  ;;  %v353_v44 = vadd.f32 %v1805_v35, %v319_v39  ;;  %v1837_v45 = vsel %vm465_vm7, 1.0, %v2140_v13  ;;  %v1780_v46 = vsel %vm234_vm8, 1.0, %v2140_v13  ;;  %520 = vmatpush.msra.mxu0 %v2464_v37 }
  0x50   : > { %v574_v47 = vand.u32 4294901760, %v2471_v42  ;;  %vm260_vm9 = vcmp.eq.s32.totalorder %v2300_v7, %v2309_v10  ;;  %vm294_vm11 = vcmp.eq.s32.totalorder %v2300_v7, %v2312_v11  ;;  %vm328_vm12 = vcmp.eq.s32.totalorder %v2300_v7, %v2317_v12 }
  0x51   : > { %v2486_v48 = vadd.f32 %v1838_v28, %v456_v43  ;;  %v387_v49 = vadd.f32 %v1813_v36, %v353_v44  ;;  %v1788_v50 = vsel %vm260_vm9, 1.0, %v2140_v13  ;;  %v1796_v51 = vsel %vm294_vm11, 1.0, %v2140_v13 }
  0x52   : > { %v575_v52 = vsub.f32 %v2471_v42, %v574_v47  ;;  %v284_v53 = vadd.f32 %v1788_v50, %v1780_v46  ;;  %v1804_v54 = vsel %vm328_vm12, 1.0, %v2140_v13  ;;  %vm362_vm10 = vcmp.eq.s32.totalorder %v2300_v7, %v2329_v15 }
  0x53   : > { %v2497_v55 = vand.u32 4294901760, %v2486_v48  ;;  %v421_v56 = vadd.f32 %v1821_v40, %v387_v49  ;;  %v1812_v58 = vsel %vm362_vm10, 1.0, %v2140_v13  ;;  %vm396_vm13 = vcmp.eq.s32.totalorder %v2300_v7, %v2337_v19 }
  0x54   : > { %v576_v59 = vand.u32 4294901760, %v575_v52  ;;  %v318_v61 = vadd.f32 %v1796_v51, %v284_v53  ;;  %v1820_v63 = vsel %vm396_vm13, 1.0, %v2140_v13  ;;  %vm430_vm14 = vcmp.eq.s32.totalorder %v2300_v7, %v2345_v22 }
  0x55   : > { %1913 = vmatpush.msra.mxu2 %v2497_v55  ;;  %v455_v14 = vadd.f32 %v1829_v41, %v421_v56  ;;  %v1828_v16 = vsel %vm430_vm14, 1.0, %v2140_v13  ;;  %vm464_vm15 = vcmp.eq.s32.totalorder %v2300_v7, %v2352_v25  ;;  %v2511_v17 = vsub.f32 %v2409_v57, %v2422_v62  ;;  %522 = vmatpush.msra.mxu0 %v2497_v55 }
  0x56   : > { %1918 = vmatpush.msra.mxu3 %v576_v59  ;;  %v352_v18 = vadd.f32 %v1804_v54, %v318_v61  ;;  %v1836_v20 = vsel %vm464_vm15, 1.0, %v2140_v13  ;;  %vm233_vm0 = vcmp.eq.s32.totalorder %v2303_v8, %v2306_v9  ;;  %vm259_vm1 = vcmp.eq.s32.totalorder %v2303_v8, %v2309_v10  ;;  %577 = vmatpush.msra.mxu1 %v576_v59  ;;  %v219_v59 = vld [vmem:[#allocation7 + $0x10] sm:$0xff] }
  0x57   : > { %v2519_v21 = vadd.f32 %v1837_v45, %v455_v14  ;;  %v580_v23 = vand.u32 4294901760, %v2511_v17  ;;  %v1779_v57 = vsel %vm233_vm0, 1.0, %v2140_v13  ;;  %v1787_v24 = vsel %vm259_vm1, 1.0, %v2140_v13 }
  0x58   : > { %v386_v26 = vadd.f32 %v1812_v58, %v352_v18  ;;  %v283_v27 = vadd.f32 %v1787_v24, %v1779_v57  ;;  %vm293_vm3 = vcmp.eq.s32.totalorder %v2303_v8, %v2312_v11  ;;  %vm327_vm4 = vcmp.eq.s32.totalorder %v2303_v8, %v2317_v12 }
  0x59   : > { %v2529_v28 = vand.u32 4294901760, %v2519_v21  ;;  %v581_v29 = vsub.f32 %v2511_v17, %v580_v23  ;;  %v1795_v30 = vsel %vm293_vm3, 1.0, %v2140_v13  ;;  %v1803_v32 = vsel %vm327_vm4, 1.0, %v2140_v13 }
  0x5a   : > { %v420_v33 = vadd.f32 %v1820_v63, %v386_v26  ;;  %v317_v34 = vadd.f32 %v1795_v30, %v283_v27  ;;  %vm361_vm5 = vcmp.eq.s32.totalorder %v2303_v8, %v2329_v15  ;;  %vm395_vm2 = vcmp.eq.s32.totalorder %v2303_v8, %v2337_v19 }
  0x5b   : > { %1914 = vmatpush.msra.mxu2 %v2529_v28  ;;  %v582_v35 = vand.u32 4294901760, %v581_v29  ;;  %v1811_v36 = vsel %vm361_vm5, 1.0, %v2140_v13  ;;  %v1819_v38 = vsel %vm395_vm2, 1.0, %v2140_v13  ;;  %vm429_vm6 = vcmp.eq.s32.totalorder %v2303_v8, %v2345_v22  ;;  %524 = vmatpush.msra.mxu0 %v2529_v28 }
  0x5c   : > { %v454_v39 = vadd.f32 %v1828_v16, %v420_v33  ;;  %v351_v40 = vadd.f32 %v1803_v32, %v317_v34  ;;  %v1827_v41 = vsel %vm429_vm6, 1.0, %v2140_v13  ;;  %vm463_vm7 = vcmp.eq.s32.totalorder %v2303_v8, %v2352_v25 }
  0x5d   : > { %1919 = vmatpush.msra.mxu3 %v582_v35  ;;  %v1835_v43 = vsel %vm463_vm7, 1.0, %v2140_v13  ;;  %v2552_v44 = vsub.f32 %v2454_v31, %v2464_v37  ;;  %vm232_vm8 = vcmp.eq.s32.totalorder %v2282_v1, %v2306_v9  ;;  %vm258_vm9 = vcmp.eq.s32.totalorder %v2282_v1, %v2309_v10  ;;  %583 = vmatpush.msra.mxu1 %v582_v35 }
  0x5e   : > { %v488_v45 = vadd.f32 %v1836_v20, %v454_v39  ;;  %v385_v46 = vadd.f32 %v1811_v36, %v351_v40  ;;  %v1778_v49 = vsel %vm232_vm8, 1.0, %v2140_v13  ;;  %v1786_v50 = vsel %vm258_vm9, 1.0, %v2140_v13 }
  0x5f   : > { %v586_v51 = vand.u32 4294901760, %v2552_v44  ;;  %v282_v52 = vadd.f32 %v1786_v50, %v1778_v49  ;;  %vm292_vm11 = vcmp.eq.s32.totalorder %v2282_v1, %v2312_v11  ;;  %vm326_vm12 = vcmp.eq.s32.totalorder %v2282_v1, %v2317_v12 }
  0x60   : > { %v2565_v9 = vand.u32 4294901760, %v488_v45  ;;  %v419_v31 = vadd.f32 %v1819_v38, %v385_v46  ;;  %v1794_v10 = vsel %vm292_vm11, 1.0, %v2140_v13  ;;  %v1802_v53 = vsel %vm326_vm12, 1.0, %v2140_v13 }
  0x61   : > { %v587_v54 = vsub.f32 %v2552_v44, %v586_v51  ;;  %v316_v56 = vadd.f32 %v1794_v10, %v282_v52  ;;  %vm360_vm10 = vcmp.eq.s32.totalorder %v2282_v1, %v2329_v15  ;;  %vm394_vm13 = vcmp.eq.s32.totalorder %v2282_v1, %v2337_v19  ;;  %v220_v19 = vld [vmem:[#allocation7 + $0x18] sm:$0xff]  ;;  %v218_v52 = vld [vmem:[#allocation7 + $0x8] sm:$0xff] }
  0x62   : > { %1915 = vmatpush.msra.mxu2 %v2565_v9  ;;  %v453_v11 = vadd.f32 %v1827_v41, %v419_v31  ;;  %v1810_v12 = vsel %vm360_vm10, 1.0, %v2140_v13  ;;  %v1818_v58 = vsel %vm394_vm13, 1.0, %v2140_v13  ;;  %vm428_vm14 = vcmp.eq.s32.totalorder %v2282_v1, %v2345_v22  ;;  %526 = vmatpush.msra.mxu0 %v2565_v9 }
  0x63   : > { %v588_v61 = vand.u32 4294901760, %v587_v54  ;;  %v350_v63 = vadd.f32 %v1802_v53, %v316_v56  ;;  %v1826_v15 = vsel %vm428_vm14, 1.0, %v2140_v13  ;;  %vm462_vm15 = vcmp.eq.s32.totalorder %v2282_v1, %v2352_v25  ;;  %v217_v25 = vld [vmem:[#allocation7] sm:$0xff] }
  0x64   : > { %v487_v14 = vadd.f32 %v1835_v43, %v453_v11  ;;  %v1834_v16 = vsel %vm462_vm15, 1.0, %v2140_v13  ;;  %v2588_v18 = vsub.f32 %v2486_v48, %v2497_v55  ;;  %vm494_vm0 = vcmask 523264  }
  0x65   : > { %1920 = vmatpush.msra.mxu3 %v588_v61  ;;  %v384_v22 = vadd.f32 %v1810_v12, %v350_v63  ;;  %v502_v20 = vsel %vm494_vm0, %v219_v59, 0  ;;  %v2593_v57 = vsub.f32 %v2519_v21, %v2529_v28  ;;  %v2596_v24 = vsub.f32 %v488_v45, %v2565_v9  ;;  %589 = vmatpush.msra.mxu1 %v588_v61 }
  0x66   : > { %v2598_v26 = vand.u32 4294901760, %v487_v14  ;;  %v592_v27 = vand.u32 4294901760, %v2588_v18  ;;  %v2601_v48 = vand.u32 4294901760, %v502_v20  ;;  %v505_v29 = vsel %vm494_vm0, %v220_v19, 0 }
  0x67   : > { %v418_v30 = vadd.f32 %v1818_v58, %v384_v22  ;;  %v598_v32 = vand.u32 4294901760, %v2593_v57  ;;  %v604_v33 = vand.u32 4294901760, %v2596_v24  ;;  %v2606_v21 = vand.u32 4294901760, %v505_v29 }
  0x68   : > { %1916 = vmatpush.msra.mxu2 %v2598_v26  ;;  %v593_v34 = vsub.f32 %v2588_v18, %v592_v27  ;;  %v2613_v35 = vsub.f32 %v502_v20, %v2601_v48  ;;  %v2616_v36 = vsub.f32 %v487_v14, %v2598_v26  ;;  %528 = vmatpush.msra.mxu0 %v2598_v26  ;;  %v496_v38 = vsel %vm494_vm0, %v217_v25, 0  ;;  %v2660_v14 = vld [vmem:[%s2271_s5 + $0x8] ss:$0 sm:$0xff] }
  0x69   : > { %v452_v39 = vadd.f32 %v1826_v15, %v418_v30  ;;  %v599_v40 = vsub.f32 %v2593_v57, %v598_v32  ;;  %v605_v41 = vsub.f32 %v2596_v24, %v604_v33  ;;  %v2627_v43 = vsub.f32 %v505_v29, %v2606_v21 }
  0x6a   : > { %v594_v45 = vand.u32 4294901760, %v593_v34  ;;  %v2630_v46 = vand.u32 4294901760, %v2613_v35  ;;  %v610_v49 = vand.u32 4294901760, %v2616_v36  ;;  %v2633_v50 = vand.u32 4294901760, %v496_v38 }
  0x6b   : > { %v486_v31 = vadd.f32 %v1834_v16, %v452_v39  ;;  %v600_v10 = vand.u32 4294901760, %v599_v40  ;;  %v606_v53 = vand.u32 4294901760, %v605_v41  ;;  %v2641_v11 = vand.u32 4294901760, %v2627_v43 }
  0x6c   : > { %1921 = vmatpush.msra.mxu3 %v594_v45  ;;  %v550_v54 = vsub.f32 %v2613_v35, %v2630_v46  ;;  %v611_v56 = vsub.f32 %v2616_v36, %v610_v49  ;;  %595 = vmatpush.msra.mxu1 %v594_v45  ;;  %v2644_v12 = vsub.f32 %v496_v38, %v2633_v50  ;;  %v499_v59 = vsel %vm494_vm0, %v218_v52, 0 }
  0x6d   : > { %v2646_v58 = vand.u32 4294901760, %v486_v31  ;;  %v2662_v16 = vand.u32 4294901760, %v499_v59  ;;  %v558_v22 = vsub.f32 %v2627_v43, %v2641_v11  ;;  %vm850_vm1 = vcmp.eq.s32.totalorder %v2285_v2, %v2660_v14 }
  0x6e   : > { %v2649_v61 = vand.u32 4294901760, %v550_v54  ;;  %1922 = vmatpush.msra.mxu3 %v600_v10  ;;  %v612_v63 = vand.u32 4294901760, %v611_v56  ;;  %601 = vmatpush.msra.mxu1 %v600_v10  ;;  %v2652_v15 = vand.u32 4294901760, %v2644_v12  ;;  %vm849_vm3 = vcmp.eq.s32.totalorder %v2288_v3, %v2660_v14 }
  0x6f   : > { %1917 = vmatpush.msra.mxu2 %v2646_v58  ;;  %v2656_v19 = vsub.f32 %v486_v31, %v2646_v58  ;;  %530 = vmatpush.msra.mxu0 %v2646_v58  ;;  %v2672_v29 = vsub.f32 %v499_v59, %v2662_v16  ;;  %v2687_v39 = vand.u32 4294901760, %v558_v22  ;;  %vm848_vm4 = vcmp.eq.s32.totalorder %v2291_v4, %v2660_v14 }
  0x70   : > { %552 = vmatmul.f32.vlgmr.msra.gmra.mxu2 %v2649_v61  ;;  %1923 = vmatpush.msra.mxu3 %v606_v53  ;;  %v534_v20 = vsub.f32 %v2644_v12, %v2652_v15  ;;  %vm847_vm5 = vcmp.eq.s32.totalorder %v2294_v5, %v2660_v14  ;;  %v1847_v45 = vsel %vm848_vm4, 1.0, %v2140_v13  ;;  %vm846_vm2 = vcmp.eq.s32.totalorder %v2297_v6, %v2660_v14 }
  0x71   : > { %647 = vmatpush.msrb.mxu2 %v2471_v42  ;;  %v616_v25 = vand.u32 4294901760, %v2656_v19  ;;  %607 = vmatpush.msra.mxu1 %v606_v53  ;;  %v2685_v38 = vand.u32 4294901760, %v2672_v29  ;;  %v2740_v31 = vsub.f32 %v1847_v45, %v1847_v45  ;;  %v1845_v10 = vsel %vm846_vm2, 1.0, %v2140_v13 }
  0x72   : > { %1924 = vmatpush.msra.mxu3 %v612_v63  ;;  %v2674_v30 = vand.u32 4294901760, %v534_v20  ;;  %750 = vmatpush.msrb.mxu0 %v574_v47  ;;  %v1849_v47 = vsel %vm850_vm1, 1.0, %v2140_v13  ;;  %vm845_vm6 = vcmp.eq.s32.totalorder %v2300_v7, %v2660_v14  ;;  %vm844_vm7 = vcmp.eq.s32.totalorder %v2303_v8, %v2660_v14 }
  0x73   : > { %650 = vmatpush.msrb.mxu2 %v2511_v17  ;;  %v617_v34 = vsub.f32 %v2656_v19, %v616_v25  ;;  %613 = vmatpush.msra.mxu1 %v612_v63  ;;  %v542_v40 = vsub.f32 %v2672_v29, %v2685_v38  ;;  %v1848_v17 = vsel %vm849_vm3, 1.0, %v2140_v13  ;;  %v946_v53 = vand.u32 4294901760, %v2740_v31 }
  0x74   : > { %536 = vmatmul.f32.vlgmr.msra.gmra.mxu0 %v2674_v30  ;;  %v2726_v52 = vsub.f32 %v1848_v17, %v1848_v17  ;;  %v2141_v54 = vmov 1.0   ;;  %v2771_v56 = vsub.f32 %v1845_v10, %v1845_v10  ;;  %vm843_vm8 = vcmp.eq.s32.totalorder %v2282_v1, %v2660_v14 }
  0x75   : > { %653 = vmatpush.msrb.mxu2 %v2552_v44  ;;  %v618_v42 = vand.u32 4294901760, %v617_v34  ;;  %754 = vmatpush.msrb.mxu0 %v580_v23  ;;  %v2712_v23 = vsub.f32 %v1849_v47, %v1849_v47  ;;  %v2718_v41 = vand.u32 4294901760, %v542_v40  ;;  %v1846_v44 = vsel %vm847_vm5, 1.0, %v2140_v13  ;;  %v2856_v40 = vld [vmem:[%s2271_s5 + $0x9] ss:$0 sm:$0xff] }
  0x76   : > { %v1842_v34 = vsel %vm843_vm8, 1.0, %v2140_v13  ;;  %vm1206_vm9 = vcmp.eq.s32.totalorder %v2285_v2, %v2856_v40  ;;  %vm1205_vm11 = vcmp.eq.s32.totalorder %v2288_v3, %v2856_v40  ;;  %vm1204_vm12 = vcmp.eq.s32.totalorder %v2291_v4, %v2856_v40 }
  0x77   : > { %1925 = vmatpush.msra.mxu3 %v618_v42  ;;  %656 = vmatpush.msrb.mxu2 %v2588_v18  ;;  %v940_v18 = vand.u32 4294901760, %v2726_v52  ;;  %v1881_v10 = vsel %vm1206_vm9, 1.0, %v2140_v13  ;;  %vm1203_vm10 = vcmp.eq.s32.totalorder %v2294_v5, %v2856_v40  ;;  %vm1202_vm13 = vcmp.eq.s32.totalorder %v2297_v6, %v2856_v40 }
  0x78   : > { %560 = vmatmul.f32.gmra.mxu2 %v2687_v39  ;;  %629 = vmatmul.f32.vlgmr.msra.gmra.mxu3 %v2601_v48  ;;  %vm1201_vm14 = vcmp.eq.s32.totalorder %v2300_v7, %v2856_v40  ;;  %vm1200_vm15 = vcmp.eq.s32.totalorder %v2303_v8, %v2856_v40  ;;  %vm1199_vm0 = vcmp.eq.s32.totalorder %v2282_v1, %v2856_v40 }
  0x79   : > { %699 = vmatpush.msrb.mxu3 %v2414_v60  ;;  %659 = vmatpush.msrb.mxu2 %v2593_v57  ;;  %v941_v59 = vsub.f32 %v2726_v52, %v940_v18  ;;  %v1843_v57 = vsel %vm844_vm7, 1.0, %v2140_v13 }
  0x7a   : > { %619 = vmatpush.msra.mxu1 %v618_v42  ;;  %758 = vmatpush.msrb.mxu0 %v586_v51  ;;  %v934_v51 = vand.u32 4294901760, %v2712_v23  ;;  %v2811_v20 = vsub.f32 %v1843_v57, %v1843_v57  ;;  %v2830_v42 = vsub.f32 %v1842_v34, %v1842_v34 }
  0x7b   : > { %701 = vmatpush.msrb.mxu3 %v2422_v62  ;;  %662 = vmatpush.msrb.mxu2 %v2596_v24  ;;  %v958_v24 = vand.u32 4294901760, %v2771_v56 }
  0x7c   : > { %621 = vmatmul.f32.vlgmr.msra.gmra.mxu1 %v2633_v50  ;;  %762 = vmatpush.msrb.mxu0 %v592_v27  ;;  %v2747_v27 = vsub.f32 %v1846_v44, %v1846_v44  ;;  %v970_v47 = vand.u32 4294901760, %v2811_v20 }
  0x7d   : > { %703 = vmatpush.msrb.mxu3 %v2464_v37  ;;  %665 = vmatpush.msrb.mxu2 %v2616_v36 }
  0x7e   : > { %805 = vmatpush.msrb.mxu1 %v2414_v60  ;;  %544 = vmatmul.f32.gmra.mxu0 %v2718_v41  ;;  %v935_v60 = vsub.f32 %v2712_v23, %v934_v51  ;;  %v952_v63 = vand.u32 4294901760, %v2747_v27 }
  0x7f   : > { %705 = vmatpush.msrb.mxu3 %v2497_v55  ;;  %668 = vmatpush.msrb.mxu2 %v2656_v19 }
  0x80   : > { %633 = vmatmul.f32.gmra.mxu3 %v2606_v21  ;;  %671 = vmatmul.f32.vlgmr.msrb.gmra.mxu2 %v2644_v12 }
  0x81   : > { %707 = vmatpush.msrb.mxu3 %v2529_v28  ;;  %807 = vmatpush.msrb.mxu1 %v2422_v62  ;;  %v1844_v62 = vsel %vm845_vm6, 1.0, %v2140_v13 }
  0x82   : > { %1850 = vmatpush.msk.msra.mxu2 %vm850_vm1, %v2141_v54  ;;  %766 = vmatpush.msrb.mxu0 %v598_v32  ;;  %v947_v32 = vsub.f32 %v2740_v31, %v946_v53  ;;  %v2797_v22 = vsub.f32 %v1844_v62, %v1844_v62  ;;  %v1880_v62 = vsel %vm1205_vm11, 1.0, %v2140_v13 }
  0x83   : > { %709 = vmatpush.msrb.mxu3 %v2565_v9  ;;  %809 = vmatpush.msrb.mxu1 %v2464_v37  ;;  %v936_v37 = vand.u32 4294901760, %v935_v60  ;;  %v2888_v60 = vsub.f32 %v1881_v10, %v1881_v10 }
  0x84   : > { %625 = vmatmul.f32.gmra.mxu1 %v2662_v16  ;;  %770 = vmatpush.msrb.mxu0 %v604_v33  ;;  %v953_v33 = vsub.f32 %v2747_v27, %v952_v63  ;;  %v964_v36 = vand.u32 4294901760, %v2797_v22 }
  0x85   : > { %711 = vmatpush.msrb.mxu3 %v2598_v26  ;;  %811 = vmatpush.msrb.mxu1 %v2497_v55  ;;  %v942_v55 = vand.u32 4294901760, %v941_v59  ;;  %v1290_v57 = vand.u32 4294901760, %v2888_v60 }
  0x86   : > { %1851 = vmatpush.msk.msra.mxu2 %vm849_vm3, %v2141_v54  ;;  %774 = vmatpush.msrb.mxu0 %v610_v49  ;;  %v959_v49 = vsub.f32 %v2771_v56, %v958_v24  ;;  %v965_v19 = vsub.f32 %v2797_v22, %v964_v36 }
  0x87   : > { %713 = vmatpush.msrb.mxu3 %v2646_v58  ;;  %813 = vmatpush.msrb.mxu1 %v2529_v28  ;;  %v948_v28 = vand.u32 4294901760, %v947_v32  ;;  %v1879_v32 = vsel %vm1204_vm12, 1.0, %v2140_v13  ;;  %v1291_v34 = vsub.f32 %v2888_v60, %v1290_v57 }
  0x88   : > { %676 = vmatmul.f32.gmra.mxu2 %v2672_v29  ;;  %717 = vmatmul.f32.vlgmr.msrb.gmra.mxu3 %v2652_v15  ;;  %v966_v17 = vand.u32 4294901760, %v965_v19 }
  0x89   : > { %937 = vmatpush.msra.mxu3 %v936_v37  ;;  %815 = vmatpush.msrb.mxu1 %v2565_v9  ;;  %v954_v9 = vand.u32 4294901760, %v953_v33  ;;  %v2905_v37 = vsub.f32 %v1880_v62, %v1880_v62  ;;  %v1878_v33 = vsel %vm1203_vm10, 1.0, %v2140_v13  ;;  %v1874_v62 = vsel %vm1199_vm0, 1.0, %v2140_v13 }
  0x8a   : > { %778 = vmatpush.msrb.mxu0 %v616_v25  ;;  %1852 = vmatpush.msk.msra.mxu2 %vm848_vm4, %v2141_v54  ;;  %v976_v25 = vand.u32 4294901760, %v2830_v42 }
  0x8b   : > { %943 = vmatpush.msra.mxu3 %v942_v55  ;;  %817 = vmatpush.msrb.mxu1 %v2598_v26  ;;  %v960_v26 = vand.u32 4294901760, %v959_v49  ;;  %v2926_v55 = vsub.f32 %v1879_v32, %v1879_v32  ;;  %v2944_v49 = vsub.f32 %v1878_v33, %v1878_v33 }
  0x8c   : > { %780 = vmatmul.f32.vlgmr.msrb.gmra.mxu0 %v2633_v50  ;;  %1853 = vmatpush.msk.msra.mxu2 %vm847_vm5, %v2141_v54  ;;  %v977_v45 = vsub.f32 %v2830_v42, %v976_v25 }
  0x8d   : > { %819 = vmatpush.msrb.mxu1 %v2646_v58  ;;  %949 = vmatpush.msra.mxu3 %v948_v28  ;;  %v971_v58 = vsub.f32 %v2811_v20, %v970_v47  ;;  %v1296_v28 = vand.u32 4294901760, %v2905_v37 }
  0x8e   : > { %821 = vmatmul.f32.vlgmr.msrb.gmra.mxu1 %v2633_v50  ;;  %1007 = vmatpush.msra.mxu0 %v2712_v23  ;;  %v978_v59 = vand.u32 4294901760, %v977_v45  ;;  %v1302_v23 = vand.u32 4294901760, %v2926_v55 }
  0x8f   : > { %1858 = vmatpush.msk.msra.mxu1 %vm850_vm1, %v2141_v54  ;;  %955 = vmatpush.msra.mxu3 %v954_v9  ;;  %v972_v44 = vand.u32 4294901760, %v971_v58  ;;  %v1297_v9 = vsub.f32 %v2905_v37, %v1296_v28 }
  0x90   : > { %681 = vmatmul.f32.gmra.mxu2 %v2613_v35  ;;  %723 = vmatmul.f32.gmra.mxu3 %v2685_v38  ;;  %v1303_v58 = vsub.f32 %v2926_v55, %v1302_v23 }
  0x91   : > { %1010 = vmatpush.msra.mxu0 %v2726_v52  ;;  %1854 = vmatpush.msk.msra.mxu2 %vm846_vm2, %v2141_v54  ;;  %v1308_v52 = vand.u32 4294901760, %v2944_v49  ;;  %v1298_v45 = vand.u32 4294901760, %v1297_v9 }
  0x92   : > { %1859 = vmatpush.msk.msra.mxu1 %vm849_vm3, %v2141_v54  ;;  %961 = vmatpush.msra.mxu3 %v960_v26  ;;  %v1876_v26 = vsel %vm1201_vm14, 1.0, %v2140_v13  ;;  %v1304_v10 = vand.u32 4294901760, %v1303_v58 }
  0x93   : > { %1013 = vmatpush.msra.mxu0 %v2740_v31  ;;  %1855 = vmatpush.msk.msra.mxu2 %vm845_vm6, %v2141_v54 }
  0x94   : > { %784 = vmatmul.f32.gmra.mxu0 %v2662_v16  ;;  %1860 = vmatpush.msk.msra.mxu1 %vm848_vm4, %v2141_v54 }
  0x95   : > { %967 = vmatpush.msra.mxu3 %v966_v17  ;;  %1016 = vmatpush.msra.mxu0 %v2747_v27  ;;  %v2997_v17 = vsub.f32 %v1876_v26, %v1876_v26 }
  0x96   : > { %825 = vmatmul.f32.gmra.mxu1 %v2662_v16  ;;  %1856 = vmatpush.msk.msra.mxu2 %vm844_vm7, %v2141_v54 }
  0x97   : > { %1861 = vmatpush.msk.msra.mxu1 %vm847_vm5, %v2141_v54  ;;  %973 = vmatpush.msra.mxu3 %v972_v44  ;;  %v1875_v44 = vsel %vm1200_vm15, 1.0, %v2140_v13  ;;  %v1320_v27 = vand.u32 4294901760, %v2997_v17 }
  0x98   : > { %686 = vmatmul.f32.gmra.mxu2 %v2627_v43  ;;  %729 = vmatmul.f32.gmra.mxu3 %v2630_v46 }
  0x99   : > { %1857 = vmatpush.msk.msra.mxu2 %vm843_vm8, %v2141_v54  ;;  %1019 = vmatpush.msra.mxu0 %v2771_v56  ;;  %v3044_v56 = vsub.f32 %v1874_v62, %v1874_v62  ;;  %v1321_v33 = vsub.f32 %v2997_v17, %v1320_v27 }
  0x9a   : > { %1862 = vmatpush.msk.msra.mxu1 %vm846_vm2, %v2141_v54  ;;  %979 = vmatpush.msra.mxu3 %v978_v59 }
  0x9b   : > { %1022 = vmatpush.msra.mxu0 %v2797_v22  ;;  %1110 = vmatpush.msrb.mxu2 %v934_v51  ;;  %v1292_v51 = vand.u32 4294901760, %v1291_v34  ;;  %v1332_v34 = vand.u32 4294901760, %v3044_v56 }
  0x9c   : > { %788 = vmatmul.f32.gmra.mxu0 %v2601_v48  ;;  %1863 = vmatpush.msk.msra.mxu1 %vm845_vm6, %v2141_v54 }
  0x9d   : > { %1025 = vmatpush.msra.mxu0 %v2811_v20  ;;  %1866 = vmatpush.msk.msrb.mxu3 %vm850_vm1, %v2141_v54  ;;  %v1322_v20 = vand.u32 4294901760, %v1321_v33 }
  0x9e   : > { %829 = vmatmul.f32.gmra.mxu1 %v2601_v48  ;;  %1114 = vmatpush.msrb.mxu2 %v940_v18  ;;  %v1877_v18 = vsel %vm1202_vm13, 1.0, %v2140_v13 }
  0x9f   : > { %1864 = vmatpush.msk.msra.mxu1 %vm844_vm7, %v2141_v54  ;;  %1028 = vmatpush.msra.mxu0 %v2830_v42  ;;  %v2982_v19 = vsub.f32 %v1877_v18, %v1877_v18 }
  0xa0   : > { %735 = vmatmul.f32.gmra.mxu3 %v2641_v11  ;;  %896 = vmatmul.f32.vlgmr.msra.gmra.mxu2 %v2674_v30 }
  0xa1   : > { %1867 = vmatpush.msk.msrb.mxu3 %vm849_vm3, %v2141_v54  ;;  %1865 = vmatpush.msk.msra.mxu1 %vm843_vm8, %v2141_v54  ;;  %v1314_v31 = vand.u32 4294901760, %v2982_v19 }
  0xa2   : > { %1118 = vmatpush.msrb.mxu2 %v946_v53  ;;  %1882 = vmatpush.msk.msrb.mxu0 %vm1206_vm9, %v2141_v54  ;;  %v1309_v53 = vsub.f32 %v2944_v49, %v1308_v52 }
  0xa3   : > { %1868 = vmatpush.msk.msrb.mxu3 %vm848_vm4, %v2141_v54  ;;  %1293 = vmatpush.msrb.mxu1 %v1292_v51  ;;  %v1315_v59 = vsub.f32 %v2982_v19, %v1314_v31 }
  0xa4   : > { %792 = vmatmul.f32.gmra.mxu0 %v2606_v21  ;;  %1122 = vmatpush.msrb.mxu2 %v952_v63  ;;  %v3025_v63 = vsub.f32 %v1875_v44, %v1875_v44 }
  0xa5   : > { %1869 = vmatpush.msk.msrb.mxu3 %vm847_vm5, %v2141_v54  ;;  %1883 = vmatpush.msk.msrb.mxu0 %vm1205_vm11, %v2141_v54  ;;  %v1316_v22 = vand.u32 4294901760, %v1315_v59 }
  0xa6   : > { %833 = vmatmul.f32.gmra.mxu1 %v2606_v21  ;;  %1126 = vmatpush.msrb.mxu2 %v958_v24  ;;  %v1326_v32 = vand.u32 4294901760, %v3025_v63  ;;  %v1310_v24 = vand.u32 4294901760, %v1309_v53 }
  0xa7   : > { %1299 = vmatpush.msrb.mxu1 %v1298_v45  ;;  %1870 = vmatpush.msk.msrb.mxu3 %vm846_vm2, %v2141_v54 }
  0xa8   : > { %904 = vmatmul.f32.gmra.mxu2 %v2718_v41  ;;  %981 = vmatmul.f32.vlgmr.msra.gmra.mxu3 %v2633_v50 }
  0xa9   : > { %1884 = vmatpush.msk.msrb.mxu0 %vm1204_vm12, %v2141_v54  ;;  %1130 = vmatpush.msrb.mxu2 %v964_v36  ;;  %v1327_v36 = vsub.f32 %v3025_v63, %v1326_v32 }
  0xaa   : > { %1305 = vmatpush.msrb.mxu1 %v1304_v10  ;;  %1871 = vmatpush.msk.msrb.mxu3 %vm845_vm6, %v2141_v54 }
  0xab   : > { %1885 = vmatpush.msk.msrb.mxu0 %vm1203_vm10, %v2141_v54  ;;  %1134 = vmatpush.msrb.mxu2 %v970_v47  ;;  %v1328_v42 = vand.u32 4294901760, %v1327_v36  ;;  %v1333_v47 = vsub.f32 %v3044_v56, %v1332_v34 }
  0xac   : > { %1031 = vmatmul.f32.vlgmr.msra.gmra.mxu0 %v2644_v12  ;;  %1311 = vmatpush.msrb.mxu1 %v1310_v24 }
  0xad   : > { %1138 = vmatpush.msrb.mxu2 %v976_v25  ;;  %1872 = vmatpush.msk.msrb.mxu3 %vm844_vm7, %v2141_v54  ;;  %v1334_v14 = vand.u32 4294901760, %v1333_v47 }
  0xae   : > { %1077 = vmatmul.f32.vlgmr.msra.gmra.mxu1 %v2652_v15  ;;  %1886 = vmatpush.msk.msrb.mxu0 %vm1202_vm13, %v2141_v54 }
  0xaf   : > { %1317 = vmatpush.msrb.mxu1 %v1316_v22  ;;  %1873 = vmatpush.msk.msrb.mxu3 %vm843_vm8, %v2141_v54 }
  0xb0   : > { %912 = vmatmul.f32.gmra.mxu2 %v2649_v61  ;;  %985 = vmatmul.f32.gmra.mxu3 %v2662_v16 }
  0xb1   : > { %1887 = vmatpush.msk.msrb.mxu0 %vm1201_vm14, %v2141_v54  ;;  %1323 = vmatpush.msrb.mxu1 %v1322_v20 }
  0xb2   : > { %1363 = vmatpush.msra.mxu2 %v2888_v60  ;;  %1890 = vmatpush.msk.msra.mxu3 %vm1206_vm9, %v2141_v54 }
  0xb3   : > { %1888 = vmatpush.msk.msrb.mxu0 %vm1200_vm15, %v2141_v54  ;;  %1329 = vmatpush.msrb.mxu1 %v1328_v42 }
  0xb4   : > { %1036 = vmatmul.f32.gmra.mxu0 %v2672_v29  ;;  %1366 = vmatpush.msra.mxu2 %v2905_v37 }
  0xb5   : > { %1889 = vmatpush.msk.msrb.mxu0 %vm1199_vm0, %v2141_v54  ;;  %1891 = vmatpush.msk.msra.mxu3 %vm1205_vm11, %v2141_v54 }
  0xb6   : > { %1083 = vmatmul.f32.gmra.mxu1 %v2685_v38  ;;  %1369 = vmatpush.msra.mxu2 %v2926_v55 }
  0xb7   : > { %1335 = vmatpush.msrb.mxu1 %v1334_v14  ;;  %1892 = vmatpush.msk.msra.mxu3 %vm1204_vm12, %v2141_v54 }
  0xb8   : > { %920 = vmatmul.f32.gmra.mxu2 %v2687_v39  ;;  %989 = vmatmul.f32.gmra.mxu3 %v2601_v48 }
  0xb9   : > { %1466 = vmatpush.msra.mxu0 %v1290_v57  ;;  %1372 = vmatpush.msra.mxu2 %v2944_v49 }
  0xba   : > { %1898 = vmatpush.msk.msra.mxu1 %vm1206_vm9, %v2141_v54  ;;  %1893 = vmatpush.msk.msra.mxu3 %vm1203_vm10, %v2141_v54 }
  0xbb   : > { %1470 = vmatpush.msra.mxu0 %v1296_v28  ;;  %1375 = vmatpush.msra.mxu2 %v2982_v19 }
  0xbc   : > { %1041 = vmatmul.f32.gmra.mxu0 %v2613_v35  ;;  %1899 = vmatpush.msk.msra.mxu1 %vm1205_vm11, %v2141_v54 }
  0xbd   : > { %1894 = vmatpush.msk.msra.mxu3 %vm1202_vm13, %v2141_v54  ;;  %1474 = vmatpush.msra.mxu0 %v1302_v23 }
  0xbe   : > { %1089 = vmatmul.f32.gmra.mxu1 %v2630_v46  ;;  %1378 = vmatpush.msra.mxu2 %v2997_v17 }
  0xbf   : > { %1900 = vmatpush.msk.msra.mxu1 %vm1204_vm12, %v2141_v54  ;;  %1895 = vmatpush.msk.msra.mxu3 %vm1201_vm14, %v2141_v54 }
  0xc0   : > { %993 = vmatmul.f32.gmra.mxu3 %v2606_v21  ;;  %1140 = vmatmul.f32.vlgmr.msrb.gmra.mxu2 %v2633_v50 }
  0xc1   : > { %1478 = vmatpush.msra.mxu0 %v1308_v52  ;;  %1381 = vmatpush.msra.mxu2 %v3025_v63 }
  0xc2   : > { %1901 = vmatpush.msk.msra.mxu1 %vm1203_vm10, %v2141_v54  ;;  %1896 = vmatpush.msk.msra.mxu3 %vm1200_vm15, %v2141_v54 }
  0xc3   : > { %1384 = vmatpush.msra.mxu2 %v3044_v56  ;;  %1482 = vmatpush.msra.mxu0 %v1314_v31 }
  0xc4   : > { %1046 = vmatmul.f32.gmra.mxu0 %v2627_v43  ;;  %1902 = vmatpush.msk.msra.mxu1 %vm1202_vm13, %v2141_v54 }
  0xc5   : > { %1897 = vmatpush.msk.msra.mxu3 %vm1199_vm0, %v2141_v54  ;;  %1486 = vmatpush.msra.mxu0 %v1320_v27 }
  0xc6   : > { %1095 = vmatmul.f32.gmra.mxu1 %v2641_v11 }
  0xc7   : > { %1903 = vmatpush.msk.msra.mxu1 %vm1201_vm14, %v2141_v54  ;;  %1490 = vmatpush.msra.mxu0 %v1326_v32 }
  0xc8   : > { %1144 = vmatmul.f32.gmra.mxu2 %v2662_v16  ;;  %1181 = vmatmul.f32.vlgmr.msrb.gmra.mxu3 %v2633_v50 }
  0xc9   : > { %1904 = vmatpush.msk.msra.mxu1 %vm1200_vm15, %v2141_v54  ;;  %1494 = vmatpush.msra.mxu0 %v1332_v34 }
  0xcb   : > { %1905 = vmatpush.msk.msra.mxu1 %vm1199_vm0, %v2141_v54 }
  0xcc   : > { %1252 = vmatmul.f32.vlgmr.msrb.gmra.mxu0 %v2674_v30 }
  0xce   : > { %1337 = vmatmul.f32.vlgmr.msrb.gmra.mxu1 %v2633_v50 }
  0xd0   : > { %1148 = vmatmul.f32.gmra.mxu2 %v2601_v48  ;;  %1185 = vmatmul.f32.gmra.mxu3 %v2662_v16 }
  0xd4   : > { %1260 = vmatmul.f32.gmra.mxu0 %v2718_v41 }
  0xd6   : > { %1341 = vmatmul.f32.gmra.mxu1 %v2662_v16 }
  0xd8   : > { %1152 = vmatmul.f32.gmra.mxu2 %v2606_v21  ;;  %1189 = vmatmul.f32.gmra.mxu3 %v2601_v48 }
  0xdc   : > { %1268 = vmatmul.f32.gmra.mxu0 %v2649_v61 }
  0xde   : > { %1345 = vmatmul.f32.gmra.mxu1 %v2601_v48 }
  0xe0   : > { %1193 = vmatmul.f32.gmra.mxu3 %v2606_v21  ;;  %1387 = vmatmul.f32.vlgmr.msra.gmra.mxu2 %v2644_v12 }
  0xe4   : > { %1276 = vmatmul.f32.gmra.mxu0 %v2687_v39 }
  0xe6   : > { %1349 = vmatmul.f32.gmra.mxu1 %v2606_v21 }
  0xe8   : > { %1392 = vmatmul.f32.gmra.mxu2 %v2672_v29  ;;  %1433 = vmatmul.f32.vlgmr.msra.gmra.mxu3 %v2652_v15 }
  0xec   : > { %1496 = vmatmul.f32.vlgmr.msra.gmra.mxu0 %v2633_v50 }
  0xee   : > { %1537 = vmatmul.f32.vlgmr.msra.gmra.mxu1 %v2633_v50 }
  0xf0   : > { %1397 = vmatmul.f32.gmra.mxu2 %v2613_v35  ;;  %1439 = vmatmul.f32.gmra.mxu3 %v2685_v38 }
  0xf1   : > { %v537_v2 = vpop.f32.mrf.mxu0 }
  0xf3   : > { %v553_v1 = vpop.f32.mrf.mxu2 }
  0xf4   : > { %1500 = vmatmul.f32.gmra.mxu0 %v2662_v16 }
  0xf6   : > { %1541 = vmatmul.f32.gmra.mxu1 %v2662_v16 }
  0xf8   : > { %1402 = vmatmul.f32.gmra.mxu2 %v2627_v43  ;;  %1445 = vmatmul.f32.gmra.mxu3 %v2630_v46 }
  0xf9   : > { %v622_v3 = vpop.f32.mrf.mxu1 }
  0xfa   : > { %v623_v4 = vadd.f32 %v622_v3, %v537_v2  ;;  %v1554_v3 = vand.u32 127, %v221_v0 }
  0xfb   : > { %v561_v5 = vpop.f32.mrf.mxu2  ;;  %v630_v6 = vpop.f32.mrf.mxu3 }
  0xfc   : > { %v631_v7 = vadd.f32 %v630_v6, %v553_v1  ;;  %1504 = vmatmul.f32.gmra.mxu0 %v2601_v48  ;;  %v545_v8 = vpop.f32.mrf.mxu0 }
  0xfe   : > { %1545 = vmatmul.f32.gmra.mxu1 %v2601_v48 }
 0x100   : > { %1451 = vmatmul.f32.gmra.mxu3 %v2641_v11 }
 0x101   : > { %v626_v35 = vpop.f32.mrf.mxu1 }
 0x102   : > { %v627_v50 = vadd.f32 %v626_v35, %v545_v8 }
 0x103   : > { %v634_v12 = vpop.f32.mrf.mxu3  ;;  %v672_v61 = vpop.f32.mrf.mxu2 }
 0x104   : > { %v635_v15 = vadd.f32 %v634_v12, %v561_v5  ;;  %v673_v43 = vadd.f32 %v672_v61, %v623_v4  ;;  %1508 = vmatmul.f32.gmra.mxu0 %v2606_v21  ;;  %v1556_v5 = vstv %s1906_s20 }
 0x105   : > { %v1557_v8 = vadd.s32 %v1556_v5, %v1554_v3 }
 0x106   : > { %1549 = vmatmul.f32.gmra.mxu1 %v2606_v21 }
 0x107   : > { %vm1558_vm1 = vcmp.lt.s32.totalorder %v1557_v8, 200 }
 0x109   : > { %v781_v46 = vpop.f32.mrf.mxu0 }
 0x10b   : > { %v677_v16 = vpop.f32.mrf.mxu2  ;;  %v718_v29 = vpop.f32.mrf.mxu3 }
 0x10c   : > { %v678_v30 = vadd.f32 %v677_v16, %v627_v50  ;;  %v719_v38 = vadd.f32 %v718_v29, %v673_v43  ;;  %v822_v39 = vpop.f32.mrf.mxu1 }
 0x10e   : > { %v782_v48 = vadd.f32 %v781_v46, %v719_v38 }
 0x110   : > { %v823_v41 = vadd.f32 %v822_v39, %v782_v48 }
 0x111   : > { %v785_v54 = vpop.f32.mrf.mxu0 }
 0x112   : > { %v837_v61 = vmul.f32 0.125, %v823_v41 }
 0x113   : > { %v682_v11 = vpop.f32.mrf.mxu2  ;;  %v724_v25 = vpop.f32.mrf.mxu3 }
 0x114   : > { %v683_v40 = vadd.f32 %v682_v11, %v631_v7  ;;  %v725_v60 = vadd.f32 %v724_v25, %v678_v30  ;;  %v826_v57 = vpop.f32.mrf.mxu1 }
 0x116   : > { %v786_v37 = vadd.f32 %v785_v54, %v725_v60 }
 0x118   : > { %v827_v55 = vadd.f32 %v826_v57, %v786_v37 }
 0x119   : > { %v789_v28 = vpop.f32.mrf.mxu0 }
 0x11a   : > { %v838_v48 = vmul.f32 0.125, %v827_v55 }
 0x11b   : > { %v687_v49 = vpop.f32.mrf.mxu2  ;;  %v730_v23 = vpop.f32.mrf.mxu3 }
 0x11c   : > { %v688_v21 = vadd.f32 %v687_v49, %v635_v15  ;;  %v731_v51 = vadd.f32 %v730_v23, %v683_v40  ;;  %v830_v9 = vpop.f32.mrf.mxu1  ;;  %v3238_v15 = vsel %vm1558_vm1, 1.0, %v2140_v13 }
 0x11d   : > { %v3241_v30 = vmul.f32 %v3238_v15, %v837_v61  ;;  %v3250_v60 = vmul.f32 %v3238_v15, %v838_v48 }
 0x11e   : > { %v790_v52 = vadd.f32 %v789_v28, %v731_v51 }
 0x11f   : > { %v1573_v54 = vmul.f32 %v3241_v30, %v3241_v30  ;;  %v1574_v55 = vmul.f32 %v3250_v60, %v3250_v60 }
 0x120   : > { %v831_v18 = vadd.f32 %v830_v9, %v790_v52 }
 0x121   : > { %v793_v19 = vpop.f32.mrf.mxu0 }
 0x123   : > { %v736_v26 = vpop.f32.mrf.mxu3  ;;  %v897_v58 = vpop.f32.mrf.mxu2 }
 0x124   : > { %v737_v17 = vadd.f32 %v736_v26, %v688_v21  ;;  %v834_v45 = vpop.f32.mrf.mxu1  ;;  %v839_v21 = vmul.f32 0.125, %v831_v18 }
 0x126   : > { %v794_v31 = vadd.f32 %v793_v19, %v737_v17 }
 0x128   : > { %v3233_v53 = vadd.f32 %v834_v45, %v794_v31 }
 0x129   : > { %v1032_v44 = vpop.f32.mrf.mxu0 }
 0x12b   : > { %v905_v27 = vpop.f32.mrf.mxu2  ;;  %v982_v63 = vpop.f32.mrf.mxu3 }
 0x12c   : > { %v983_v10 = vadd.f32 %v982_v63, %v897_v58  ;;  %v1078_v62 = vpop.f32.mrf.mxu1 }
 0x12e   : > { %v1033_v59 = vadd.f32 %v1032_v44, %v983_v10  ;;  %v3257_v44 = vmul.f32 %v3238_v15, %v839_v21 }
 0x130   : > { %v1079_v32 = vadd.f32 %v1078_v62, %v1033_v59  ;;  %v1575_v18 = vmul.f32 %v3257_v44, %v3257_v44 }
 0x131   : > { %v1037_v56 = vpop.f32.mrf.mxu0 }
 0x133   : > { %v913_v24 = vpop.f32.mrf.mxu2  ;;  %v986_v33 = vpop.f32.mrf.mxu3 }
 0x134   : > { %v987_v22 = vadd.f32 %v986_v33, %v905_v27  ;;  %v1084_v36 = vpop.f32.mrf.mxu1  ;;  %v840_v33 = vmul.f32 0.125, %v3233_v53 }
 0x136   : > { %v1038_v34 = vadd.f32 %v1037_v56, %v987_v22 }
 0x138   : > { %v1085_v20 = vadd.f32 %v1084_v36, %v1038_v34 }
 0x139   : > { %v1042_v42 = vpop.f32.mrf.mxu0 }
 0x13b   : > { %v921_v47 = vpop.f32.mrf.mxu2  ;;  %v990_v14 = vpop.f32.mrf.mxu3 }
 0x13c   : > { %v991_v1 = vadd.f32 %v990_v14, %v913_v24  ;;  %v1090_v2 = vpop.f32.mrf.mxu1 }
 0x13e   : > { %v1043_v4 = vadd.f32 %v1042_v42, %v991_v1  ;;  %v1564_v1 = vmul.f32 %v3238_v15, %v840_v33 }
 0x140   : > { %v1091_v6 = vadd.f32 %v1090_v2, %v1043_v4 }
 0x141   : > { %v1047_v7 = vpop.f32.mrf.mxu0 }
 0x143   : > { %v994_v35 = vpop.f32.mrf.mxu3  ;;  %v1141_v50 = vpop.f32.mrf.mxu2 }
 0x144   : > { %v1096_v12 = vpop.f32.mrf.mxu1  ;;  %v1142_v46 = vadd.f32 %v1141_v50, %v1079_v32  ;;  %v995_v51 = vadd.f32 %v994_v35, %v921_v47 }
 0x146   : > { %v1048_v27 = vadd.f32 %v1047_v7, %v995_v51 }
 0x148   : > { %v1097_v59 = vadd.f32 %v1096_v12, %v1048_v27 }
 0x149   : > { %v1253_v43 = vpop.f32.mrf.mxu0 }
 0x14b   : > { %v1145_v16 = vpop.f32.mrf.mxu2  ;;  %v1182_v29 = vpop.f32.mrf.mxu3 }
 0x14c   : > { %v1183_v0 = vadd.f32 %v1182_v29, %v1142_v46  ;;  %v1338_v38 = vpop.f32.mrf.mxu1  ;;  %v1146_v25 = vadd.f32 %v1145_v16, %v1085_v20 }
 0x14d   : > { %v1339_v3 = vadd.f32 %v1338_v38, %v1253_v43 }
 0x14e   : > { %v1565_v39 = vmul.f32 %v3238_v15, %v1183_v0 }
 0x150   : > { %v1577_v11 = vmul.f32 %v1565_v39, %v1565_v39  ;;  %v1608_v41 = vmul.f32 %v1565_v39, %v3241_v30 }
 0x151   : > { %v1261_v13 = vpop.f32.mrf.mxu0 }
 0x152   : > { %v3247_v40 = vadd.f32 %v1577_v11, %v1573_v54 }
 0x153   : > { %v1149_v57 = vpop.f32.mrf.mxu2  ;;  %v1186_v37 = vpop.f32.mrf.mxu3 }
 0x154   : > { %v1187_v28 = vadd.f32 %v1186_v37, %v1146_v25  ;;  %v1342_v49 = vpop.f32.mrf.mxu1  ;;  %v1150_v26 = vadd.f32 %v1149_v57, %v1091_v6 }
 0x155   : > { %v1343_v61 = vadd.f32 %v1342_v49, %v1261_v13 }
 0x156   : > { %v1566_v23 = vmul.f32 %v3238_v15, %v1187_v28 }
 0x158   : > { %v1578_v9 = vmul.f32 %v1566_v23, %v1566_v23  ;;  %v1609_v52 = vmul.f32 %v1566_v23, %v3250_v60 }
 0x159   : > { %v1269_v19 = vpop.f32.mrf.mxu0 }
 0x15a   : > { %v1582_v58 = vadd.f32 %v1578_v9, %v1574_v55  ;;  %v1612_v17 = vadd.f32 %v1609_v52, %v1608_v41 }
 0x15b   : > { %v1153_v45 = vpop.f32.mrf.mxu2  ;;  %v1190_v31 = vpop.f32.mrf.mxu3 }
 0x15c   : > { %v1191_v63 = vadd.f32 %v1190_v31, %v1150_v26  ;;  %v1346_v10 = vpop.f32.mrf.mxu1  ;;  %v1154_v22 = vadd.f32 %v1153_v45, %v1097_v59 }
 0x15d   : > { %v1347_v38 = vadd.f32 %v1346_v10, %v1269_v19 }
 0x15e   : > { %v1567_v62 = vmul.f32 %v3238_v15, %v1191_v63 }
 0x160   : > { %v1579_v32 = vmul.f32 %v1567_v62, %v1567_v62  ;;  %v1610_v56 = vmul.f32 %v1567_v62, %v3257_v44 }
 0x161   : > { %v1277_v24 = vpop.f32.mrf.mxu0 }
 0x162   : > { %v1613_v36 = vadd.f32 %v1612_v17, %v1610_v56  ;;  %v1583_v34 = vadd.f32 %v1579_v32, %v1575_v18 }
 0x163   : > { %v1194_v20 = vpop.f32.mrf.mxu3  ;;  %v1388_v42 = vpop.f32.mrf.mxu2 }
 0x164   : > { %v1195_v47 = vadd.f32 %v1194_v20, %v1154_v22  ;;  %v1350_v14 = vpop.f32.mrf.mxu1  ;;  %v1389_v7 = vadd.f32 %v1388_v42, %v1339_v3 }
 0x165   : > { %v1351_v45 = vadd.f32 %v1350_v14, %v1277_v24 }
 0x166   : > { %v1568_v2 = vmul.f32 %v3238_v15, %v1195_v47  ;;  %v1576_v47 = vmul.f32 %v1564_v1, %v1564_v1 }
 0x168   : > { %v1611_v4 = vmul.f32 %v1568_v2, %v1564_v1  ;;  %v1580_v20 = vmul.f32 %v1568_v2, %v1568_v2 }
 0x169   : > { %v1497_v5 = vpop.f32.mrf.mxu0 }
 0x16a   : > { %v1614_v6 = vadd.f32 %v1613_v36, %v1611_v4  ;;  %v1584_v3 = vadd.f32 %v1580_v20, %v1576_v47 }
 0x16b   : > { %v1393_v8 = vpop.f32.mrf.mxu2  ;;  %v1434_v35 = vpop.f32.mrf.mxu3 }
 0x16c   : > { %v1435_v50 = vadd.f32 %v1434_v35, %v1389_v7  ;;  %v1538_v53 = vpop.f32.mrf.mxu1  ;;  %v1394_v16 = vadd.f32 %v1393_v8, %v1343_v61 }
 0x16e   : > { %v1498_v12 = vadd.f32 %v1497_v5, %v1435_v50 }
 0x170   : > { %v1539_v29 = vadd.f32 %v1538_v53, %v1498_v12 }
 0x171   : > { %v1501_v46 = vpop.f32.mrf.mxu0 }
 0x172   : > { %v1569_v11 = vmul.f32 %v3238_v15, %v1539_v29 }
 0x173   : > { %v1440_v0 = vpop.f32.mrf.mxu3  ;;  %v1398_v48 = vpop.f32.mrf.mxu2 }
 0x174   : > { %v1542_v39 = vpop.f32.mrf.mxu1  ;;  %v1441_v54 = vadd.f32 %v1440_v0, %v1394_v16  ;;  %v1399_v57 = vadd.f32 %v1398_v48, %v1347_v38  ;;  %v1585_v37 = vmul.f32 %v1569_v11, %v1569_v11  ;;  %v1621_v49 = vmul.f32 %v1569_v11, %v3241_v30 }
 0x176   : > { %v1502_v43 = vadd.f32 %v1501_v46, %v1441_v54  ;;  %v1589_v17 = vadd.f32 %v1585_v37, %v3247_v40 }
 0x178   : > { %v1543_v41 = vadd.f32 %v1542_v39, %v1502_v43 }
 0x179   : > { %v1505_v25 = vpop.f32.mrf.mxu0 }
 0x17a   : > { %v1570_v28 = vmul.f32 %v3238_v15, %v1543_v41 }
 0x17b   : > { %v1446_v23 = vpop.f32.mrf.mxu3  ;;  %v1403_v26 = vpop.f32.mrf.mxu2 }
 0x17c   : > { %v1447_v55 = vadd.f32 %v1446_v23, %v1399_v57  ;;  %v1546_v13 = vpop.f32.mrf.mxu1  ;;  %v1586_v21 = vmul.f32 %v1570_v28, %v1570_v28  ;;  %v1622_v51 = vmul.f32 %v1570_v28, %v3250_v60  ;;  %v1404_v63 = vadd.f32 %v1403_v26, %v1351_v45 }
 0x17d   : > { %v1615_v60 = vrot.slane %v1614_v6, 4 }
 0x17e   : > { %v1506_v9 = vadd.f32 %v1505_v25, %v1447_v55  ;;  %v1625_v52 = vadd.f32 %v1622_v51, %v1621_v49  ;;  %v1590_v19 = vadd.f32 %v1586_v21, %v1582_v58 }
 0x17f   : > { %v1616_v24 = vadd.f32 %v1615_v60, %v1614_v6 }
 0x180   : > { %v1547_v31 = vadd.f32 %v1546_v13, %v1506_v9  ;;  %v1593_v27 = vadd.f32 %v1590_v19, %v1589_v17 }
 0x181   : > { %v1509_v18 = vpop.f32.mrf.mxu0  ;;  %v1617_v5 = vrot.slane %v1616_v24, 2 }
 0x182   : > { %v1571_v10 = vmul.f32 %v3238_v15, %v1547_v31 }
 0x183   : > { %v1452_v62 = vpop.f32.mrf.mxu3  ;;  %v1618_v50 = vadd.f32 %v1617_v5, %v1616_v24 }
 0x184   : > { %v1587_v59 = vmul.f32 %v1571_v10, %v1571_v10  ;;  %v1623_v30 = vmul.f32 %v1571_v10, %v3257_v44  ;;  %v1453_v32 = vadd.f32 %v1452_v62, %v1404_v63  ;;  %v1550_v56 = vpop.f32.mrf.mxu1 }
 0x186   : > { %v1626_v33 = vadd.f32 %v1625_v52, %v1623_v30  ;;  %v1510_v22 = vadd.f32 %v1509_v18, %v1453_v32  ;;  %v1591_v36 = vadd.f32 %v1587_v59, %v1583_v34  ;;  %v1619_v34 = vrot.slane %v1618_v50, 1 }
 0x188   : > { %v1551_v40 = vadd.f32 %v1550_v56, %v1510_v22  ;;  %v1594_v58 = vadd.f32 %v1593_v27, %v1591_v36  ;;  %v1620_v46 = vadd.f32 %v1619_v34, %v1618_v50 }
 0x18a   : > { %v1572_v42 = vmul.f32 %v3238_v15, %v1551_v40 }
 0x18c   : > { %v1624_v14 = vmul.f32 %v1572_v42, %v1564_v1  ;;  %v1588_v4 = vmul.f32 %v1572_v42, %v1572_v42 }
 0x18e   : > { %v1627_v7 = vadd.f32 %v1626_v33, %v1624_v14  ;;  %v1592_v8 = vadd.f32 %v1588_v4, %v1584_v3 }
 0x190   : > { %v1628_v44 = vrot.slane %v1627_v7, 4  ;;  %v1595_v35 = vadd.f32 %v1594_v58, %v1592_v8 }
 0x192   : > { %v1629_v53 = vadd.f32 %v1628_v44, %v1627_v7  ;;  %1596 = vadd.xlane.f32.xlu0 %v1595_v35 }
 0x194   : > { %v1630_v12 = vrot.slane %v1629_v53, 2 }
 0x196   : > { %v1631_v2 = vadd.f32 %v1630_v12, %v1629_v53 }
 0x198   : > { %v1632_v61 = vrot.slane %v1631_v2, 1 }
 0x19a   : > { %v1633_v6 = vadd.f32 %v1632_v61, %v1631_v2 }
 0x19c   : > { %v1634_v16 = vsub.f32 %v1633_v6, %v1620_v46 }
 0x19e   : > { %v1636_v15 = vsub.f32 0.0, %v1634_v16  ;;  %v1635_v57 = vmax.f32 %v1634_v16, 0.0 }
 0x1a0   : > { %v1639_v29 = vand.u32 2147483647, %v1636_v15  ;;  %vm1637_vm4 = vcmp.ne.f32.partialorder %v1636_v15, %v1636_v15 }
 0x1a2   : > { %v1640_v1 = vsub.f32 0.0, %v1639_v29 }
 0x1a4   : > { %v1641_v0 = vmul.f32 1.442695, %v1640_v1 }
 0x1a6   : > { %2000 = vpow2.f32 %v1641_v0 }
 0x1ac   : > { %v2001_v39 = vpop.eup %2000 }
 0x1ad   : > { %v1643_v48 = vadd.f32 1.0, %v2001_v39  ;;  %v1646_v54 = vmul.f32 -0.5, %v2001_v39  ;;  %v1649_v43 = vand.u32 2147483647, %v2001_v39 }
 0x1af   : > { %2002 = vlog2.f32 %v1643_v48  ;;  %v1647_v11 = vadd.f32 1.0, %v1646_v54  ;;  %vm1650_vm3 = vcmp.lt.f32.partialorder %v1649_v43, 0.0004427343 }
 0x1b1   : > { %v1648_v25 = vmul.f32 %v2001_v39, %v1647_v11 }
 0x1b5   : > { %v2003_v38 = vpop.eup %2002 }
 0x1b6   : > { %v1645_v41 = vmul.f32 0.6931472, %v2003_v38 }
 0x1b8   : > { %v1651_v37 = vsel %vm1650_vm3, %v1648_v25, %v1645_v41 }
 0x1b9   : > { %v1652_v28 = vadd.f32 %v1651_v37, %v1635_v57 }
 0x1bb   : > { %v1653_v23 = vsel %vm1637_vm4, %v1634_v16, %v1652_v28 }
 0x1bc   : > { %1654 = vst [vmem:[%s208_s25] sm:$0x1] %v1653_v23 }
 0x1bd   : > { %2091 = shalt.err (!%p2088_p10)
}
 0x1be   : > { %1934 = dma.vmem_to_hbm [thread:$0]  (%p2237_p7), %s1670_s23, 16, %s1672_s24, %s1656_s26   ;;  %vm1606_vm5 = vcmask 0  }
 0x1bf   : > { %p214_p12 = scmp.lt.s32.totalorder %s2188_s18, 1 }
 0x1c1   : > { %s3329_s18 = smov (!%p214_p12, %s2188_s18), 1 }
 0x1c2   : > { %s216_s5 = scalar_lea.vmem %s3317_s4, %s3329_s18 }
 0x205   : > { %v1597_v55 = vpop.xlane.xlu0 %1596 }
 0x206   : > { %v1598_v13 = vrot.slane %v1597_v55, 4 }
 0x208   : > { %v1599_v49 = vadd.f32 %v1598_v13, %v1597_v55 }
 0x20a   : > { %v1600_v21 = vrot.slane %v1599_v49, 2 }
 0x20c   : > { %v1601_v51 = vadd.f32 %v1600_v21, %v1599_v49 }
 0x20e   : > { %v1602_v9 = vrot.slane %v1601_v51, 1 }
 0x210   : > { %v1603_v52 = vadd.f32 %v1602_v9, %v1601_v51 }
 0x212   : > { %1926 = vpush %v1603_v52 }
 0x243   : > { %s1927_s20 = spop %1926 }
 0x244   : > { %v1605_v26 = vstv %s1927_s20 }
 0x245   : > { %1607 = vst.msk [vmem:[%s216_s5] sm:$0x1] %vm1606_vm5, %v1605_v26 }
 0x246 PF: > { %s1686_s8 = sand.u32 1, %s2122_s15   ;;  %p3323_p7 = scmp.ge.s32.totalorder %s2134_s17, 2 }
 0x247   : > { %s1687_s25 = scalar_lea.sflag [#allocation6], %s1686_s8 }
 0x248   : > { %p1945_p13 = pnand %p3323_p7, %p2202_p6 }
 0x24a   : > { %p1946_p0 = pneg %p1945_p13 }
 0x24c   : > { %2117 = dma.done.wait (%p1946_p0), %s1687_s25, 16  }
 0x24d   : > { %2119 = vsyncadd (%p1946_p0), %s1687_s25, 4294967280  ;;  %p20_p3 = scmp.ge.s32.totalorder %s2220_s28, 4   ;;  %s3324_s15 = smov %s2126_s0 }
 0x24e   : > { %s3325_s0 = smov %s2130_s16  ;;  %s3326_s16 = smov %s2233_s7 }
 0x24f   : > { %s3327_s17 = smov %s2220_s28  ;;  %22 = sbr.rel (!%p20_p3) target bundleno = 6 (0x6), region = 89 }
 0x254   :  { %1698 = vsyncpa [#allocation5], 1 }
 0x255   :  { %1700 = vsyncpa [#allocation5 + $0x1], 1 }
 0x256   :  { %1701 = vsyncpa [#allocation8], 1 }
 0x257   :  { %1702 = vsyncpa [#allocation6], 1 }
 0x258   :  { %1704 = vsyncpa [#allocation6 + $0x1], 1 }

</bundles_post_ra>
